<compile_context>
chip_gen: v6e
topology: v6e:2x2x1
jax: 0.10.0
libtpu: 0.0.40
codegen_flags: <defaults>
</compile_context>

<pallas_src>
import functools

import jax
import jax.numpy as jnp
from jax.experimental import pallas as pl
from jax.experimental.pallas import tpu as pltpu

LN_EPS = 1e-5  # PyTorch nn.LayerNorm / TransformerEncoderLayer default


def _layernorm(x, w, b):
    mu = jnp.mean(x, axis=-1, keepdims=True)
    xc = x - mu
    var = jnp.mean(xc * xc, axis=-1, keepdims=True)
    inv = jax.lax.rsqrt(var + LN_EPS)
    return xc * inv * w + b


# ----------------------------------------------------------------------------
# Fused kernel: embedding + num_layers encoder layers + softmax head,
# one grid step per batch element.
# ----------------------------------------------------------------------------
def _fused_policy_kernel(
    x_ref,                       # (S, I)      src slab for this batch element
    blkmask_ref,                 # (H*S, D)    block-diag head mask
    bsum_ref,                    # (H*S, H)    per-head column-block sum indicator
    bexp_ref,                    # (H, H*S)    transpose of bsum (precomputed)
    emb_w_ref, emb_b_ref,        # (I, D), (1, D)
    wq_ref, bq_ref,              # (L, D, D), (L, 1, D)
    wk_ref, bk_ref,              # (L, D, D), (L, 1, D)
    wv_ref, bv_ref,              # (L, D, D), (L, 1, D)
    wo_ref, bo_ref,              # (L, D, D), (L, 1, D)
    ln1w_ref, ln1b_ref,          # (L, 1, D)
    w1_ref, b1_ref,              # (L, D, F), (L, 1, F)
    w2_ref, b2_ref,              # (L, F, D), (L, 1, D)
    ln2w_ref, ln2b_ref,          # (L, 1, D)
    fc_w_ref, fc_b_ref,          # (D, A), (1, A)
    o_ref,                       # (1, A)
    *,
    nhead,
    num_layers,
):
    S = x_ref.shape[0]
    D = emb_w_ref.shape[1]
    Dh = D // nhead
    scale = 1.0 / (Dh ** 0.5)

    # ---- embedding: (S, I) @ (I, D) -------------------------------------
    x = (jnp.dot(x_ref[...], emb_w_ref[...], preferred_element_type=jnp.float32)
         + emb_b_ref[...])                                           # (S, D)

    # Head masks (layer-invariant; loaded once, hoisted out of the layer loop).
    blk_mask = blkmask_ref[...]                                      # (H*S, D)
    bsum = bsum_ref[...]                                             # (H*S, H)
    bexp = bexp_ref[...]                                             # (H, H*S)

    def layer_body(l, x):
        # ---- Q/K/V projections (weights pre-transposed; no in-kernel .T) --
        q = jnp.dot(x, wq_ref[l], preferred_element_type=jnp.float32) + bq_ref[l]
        k = jnp.dot(x, wk_ref[l], preferred_element_type=jnp.float32) + bk_ref[l]
        v = jnp.dot(x, wv_ref[l], preferred_element_type=jnp.float32) + bv_ref[l]

        # ---- block-diagonal multi-head attention (no per-head slicing) ----
        # k_blk[h*S + j, d] = k[j, d] if d belongs to head h else 0
        k_blk = jnp.concatenate([k] * nhead, axis=0) * blk_mask      # (H*S, D)
        v_blk = jnp.concatenate([v] * nhead, axis=0) * blk_mask      # (H*S, D)

        # scores[i, h*S + j] = <q_h(i), k_h(j)> * scale
        s = jnp.einsum("sd,rd->sr", q, k_blk,
                       preferred_element_type=jnp.float32) * scale   # (S, H*S)
        # Global row max is a valid (and stable) shift for every head's softmax.
        s = s - jnp.max(s, axis=-1, keepdims=True)
        e = jnp.exp(s)
        denom = jnp.dot(e, bsum, preferred_element_type=jnp.float32)  # (S, H)
        inv = pl.reciprocal(denom, approx=True)                       # EUP slot
        p = e * jnp.dot(inv, bexp, preferred_element_type=jnp.float32)  # (S, H*S)

        attn = jnp.dot(p, v_blk, preferred_element_type=jnp.float32)    # (S, D)
        attn = (jnp.dot(attn, wo_ref[l], preferred_element_type=jnp.float32)
                + bo_ref[l])

        # ---- add & norm 1 --------------------------------------------------
        x = _layernorm(x + attn, ln1w_ref[l], ln1b_ref[l])

        # ---- feed-forward ----------------------------------------------------
        ff = jnp.maximum(
            jnp.dot(x, w1_ref[l], preferred_element_type=jnp.float32) + b1_ref[l],
            0.0)
        ff = jnp.dot(ff, w2_ref[l], preferred_element_type=jnp.float32) + b2_ref[l]

        # ---- add & norm 2 ----------------------------------------------------
        return _layernorm(x + ff, ln2w_ref[l], ln2b_ref[l])

    x = jax.lax.fori_loop(0, num_layers, layer_body, x, unroll=True)

    # ---- policy head on the last sequence position ------------------------
    x_last = x[S - 1:S, :]                                           # (1, D)
    logits = (jnp.dot(x_last, fc_w_ref[...], preferred_element_type=jnp.float32)
              + fc_b_ref[...])                                       # (1, A)
    logits = logits - jnp.max(logits, axis=-1, keepdims=True)
    ez = jnp.exp(logits)
    # Exact division so the policy distribution sums to 1 (PyTorch softmax).
    o_ref[...] = ez / jnp.sum(ez, axis=-1, keepdims=True)


# ----------------------------------------------------------------------------
# Wrapper: single pallas_call over grid=(B,)
# ----------------------------------------------------------------------------
def transformer_policy_forward(src, packed, *, nhead, num_layers):
    """src: (S, B, input_dim) -> action probs (B, action_dim)."""
    S, B, I = src.shape
    D = packed["emb_w"].shape[1]
    A = packed["fc_w"].shape[1]
    Dh = D // nhead
    HS = nhead * S

    # One tiny host-side transpose of the raw input; all intermediate
    # activations stay in VMEM inside the fused kernel.
    x_bsi = jnp.transpose(src, (1, 0, 2))                            # (B, S, I)

    # Precompute head-block masks (avoids in-kernel iota / integer division).
    head_of_row = (jnp.arange(HS, dtype=jnp.int32) // S)[:, None]    # (HS, 1)
    blk_mask = (head_of_row ==
                (jnp.arange(D, dtype=jnp.int32) // Dh)[None, :]).astype(jnp.float32)
    bsum = (head_of_row ==
            jnp.arange(nhead, dtype=jnp.int32)[None, :]).astype(jnp.float32)
    bexp = bsum.T

    const_args = (
        blk_mask, bsum, bexp,
        packed["emb_w"], packed["emb_b"],
        packed["wq"], packed["bq"], packed["wk"], packed["bk"],
        packed["wv"], packed["bv"], packed["wo"], packed["bo"],
        packed["ln1w"], packed["ln1b"],
        packed["w1"], packed["b1"], packed["w2"], packed["b2"],
        packed["ln2w"], packed["ln2b"],
        packed["fc_w"], packed["fc_b"],
    )

    def _const_spec(arr):
        nd = arr.ndim
        return pl.BlockSpec(arr.shape, lambda b, _nd=nd: (0,) * _nd)

    kernel = functools.partial(_fused_policy_kernel, nhead=nhead,
                               num_layers=num_layers)

    out = pl.pallas_call(
        kernel,
        out_shape=jax.ShapeDtypeStruct((B, 1, A), jnp.float32),
        grid=(B,),
        in_specs=[pl.BlockSpec((None, S, I), lambda b: (b, 0, 0))]
                 + [_const_spec(a) for a in const_args],
        out_specs=pl.BlockSpec((None, 1, A), lambda b: (b, 0, 0)),
        compiler_params=pltpu.CompilerParams(
            dimension_semantics=("parallel",),   # both TCs busy on v7x
        ),
    )(x_bsi, *const_args)
    return out.reshape(B, A)


# ----------------------------------------------------------------------------
# Parameters: built in PyTorch layout, then packed (pre-transposed + stacked).
# ----------------------------------------------------------------------------
def make_params(key, input_dim, action_dim, d_model, ffn_dim, num_layers):
    def dense(k, n_out, n_in, scale=0.05):
        kw, kb = jax.random.split(k)
        return (scale * jax.random.normal(kw, (n_out, n_in), jnp.float32),
                scale * jax.random.normal(kb, (n_out,), jnp.float32))

    keys = jax.random.split(key, 2 + num_layers)
    emb_w, emb_b = dense(keys[0], d_model, input_dim)
    fc_w, fc_b = dense(keys[1], action_dim, d_model)

    layers = []
    for l in range(num_layers):
        ks = jax.random.split(keys[2 + l], 4)
        in_proj_w, in_proj_b = dense(ks[0], 3 * d_model, d_model)
        out_proj_w, out_proj_b = dense(ks[1], d_model, d_model)
        w1, b1 = dense(ks[2], ffn_dim, d_model)
        w2, b2 = dense(ks[3], d_model, ffn_dim)
        layers.append(dict(
            in_proj_w=in_proj_w, in_proj_b=in_proj_b,
            out_proj_w=out_proj_w, out_proj_b=out_proj_b,
            ln1_w=jnp.ones((d_model,), jnp.float32),
            ln1_b=jnp.zeros((d_model,), jnp.float32),
            w1=w1, b1=b1, w2=w2, b2=b2,
            ln2_w=jnp.ones((d_model,), jnp.float32),
            ln2_b=jnp.zeros((d_model,), jnp.float32),
        ))
    return dict(emb_w=emb_w, emb_b=emb_b, fc_w=fc_w, fc_b=fc_b, layers=layers)


def pack_params(params):
    """Pre-transpose every matrix to (in, out) and stack per-layer weights on L."""
    D = params["emb_w"].shape[0]

    def stack(fn):
        return jnp.stack([fn(p) for p in params["layers"]], axis=0)

    return dict(
        emb_w=params["emb_w"].T, emb_b=params["emb_b"].reshape(1, -1),
        fc_w=params["fc_w"].T, fc_b=params["fc_b"].reshape(1, -1),
        wq=stack(lambda p: p["in_proj_w"][0 * D:1 * D].T),
        bq=stack(lambda p: p["in_proj_b"][0 * D:1 * D].reshape(1, -1)),
        wk=stack(lambda p: p["in_proj_w"][1 * D:2 * D].T),
        bk=stack(lambda p: p["in_proj_b"][1 * D:2 * D].reshape(1, -1)),
        wv=stack(lambda p: p["in_proj_w"][2 * D:3 * D].T),
        bv=stack(lambda p: p["in_proj_b"][2 * D:3 * D].reshape(1, -1)),
        wo=stack(lambda p: p["out_proj_w"].T),
        bo=stack(lambda p: p["out_proj_b"].reshape(1, -1)),
        ln1w=stack(lambda p: p["ln1_w"].reshape(1, -1)),
        ln1b=stack(lambda p: p["ln1_b"].reshape(1, -1)),
        w1=stack(lambda p: p["w1"].T),
        b1=stack(lambda p: p["b1"].reshape(1, -1)),
        w2=stack(lambda p: p["w2"].T),
        b2=stack(lambda p: p["b2"].reshape(1, -1)),
        ln2w=stack(lambda p: p["ln2_w"].reshape(1, -1)),
        ln2b=stack(lambda p: p["ln2_b"].reshape(1, -1)),
    )


# ----------------------------------------------------------------------------
# Pure-JAX reference (for correctness check of the fused kernel)
# ----------------------------------------------------------------------------
def _reference_forward(src, packed, *, nhead, num_layers):
    S, B, I = src.shape
    D = packed["emb_w"].shape[1]
    Dh = D // nhead
    x = src @ packed["emb_w"] + packed["emb_b"][0]                   # (S, B, D)
    for l in range(num_layers):
        q = x @ packed["wq"][l] + packed["bq"][l, 0]
        k = x @ packed["wk"][l] + packed["bk"][l, 0]
        v = x @ packed["wv"][l] + packed["bv"][l, 0]
        qh = q.reshape(S, B, nhead, Dh)
        kh = k.reshape(S, B, nhead, Dh)
        vh = v.reshape(S, B, nhead, Dh)
        s = jnp.einsum("sbhd,tbhd->bhst", qh, kh) * (1.0 / (Dh ** 0.5))
        p = jax.nn.softmax(s, axis=-1)
        o = jnp.einsum("bhst,tbhd->sbhd", p, vh).reshape(S, B, D)
        o = o @ packed["wo"][l] + packed["bo"][l, 0]
        x = _layernorm(x + o, packed["ln1w"][l, 0], packed["ln1b"][l, 0])
        f = jax.nn.relu(x @ packed["w1"][l] + packed["b1"][l, 0])
        f = f @ packed["w2"][l] + packed["b2"][l, 0]
        x = _layernorm(x + f, packed["ln2w"][l, 0], packed["ln2b"][l, 0])
    logits = x[-1] @ packed["fc_w"] + packed["fc_b"][0]
    return jax.nn.softmax(logits, axis=-1)


if __name__ == "__main__":
    # Small shapes consistent with the module's forward signature.
    S, B = 8, 2
    INPUT_DIM = 16
    ACTION_DIM = 8
    D_MODEL = 32        # module's `dim_feedforward` ctor arg is used as d_model
    NHEAD = 4
    NUM_LAYERS = 2
    FFN_DIM = 64        # TODO(synk): stock PyTorch TransformerEncoderLayer inner FFN dim defaults to 2048; scaled down for the small test.

    key = jax.random.PRNGKey(0)
    k_x, k_p = jax.random.split(key)
    src = jax.random.normal(k_x, (S, B, INPUT_DIM), jnp.float32)
    params = make_params(k_p, INPUT_DIM, ACTION_DIM, D_MODEL, FFN_DIM, NUM_LAYERS)
    packed = pack_params(params)

    fwd = jax.jit(functools.partial(transformer_policy_forward,
                                    nhead=NHEAD, num_layers=NUM_LAYERS))
    probs = jax.block_until_ready(fwd(src, packed))

    ref = _reference_forward(src, packed, nhead=NHEAD, num_layers=NUM_LAYERS)

    assert probs.shape == (B, ACTION_DIM)
    assert bool(jnp.all(jnp.isfinite(probs)))
    assert bool(jnp.allclose(jnp.sum(probs, axis=-1), 1.0, atol=1e-5))
    # approx-reciprocal in the attention softmax gives ~1e-4 relative deviation.
    assert bool(jnp.allclose(probs, ref, atol=5e-3))
    print("KERNEL_OK")
</pallas_src>

<mosaic_0001>
module attributes {stable_mosaic.version = 11 : i64} {
  func.func @_fused_policy_kernel(%arg0: i32, %arg1: memref<1x8x16xf32, #tpu.memory_space<vmem>>, %arg2: memref<32x32xf32, #tpu.memory_space<vmem>>, %arg3: memref<32x4xf32, #tpu.memory_space<vmem>>, %arg4: memref<4x32xf32, #tpu.memory_space<vmem>>, %arg5: memref<16x32xf32, #tpu.memory_space<vmem>>, %arg6: memref<1x32xf32, #tpu.memory_space<vmem>>, %arg7: memref<2x32x32xf32, #tpu.memory_space<vmem>>, %arg8: memref<2x1x32xf32, #tpu.memory_space<vmem>>, %arg9: memref<2x32x32xf32, #tpu.memory_space<vmem>>, %arg10: memref<2x1x32xf32, #tpu.memory_space<vmem>>, %arg11: memref<2x32x32xf32, #tpu.memory_space<vmem>>, %arg12: memref<2x1x32xf32, #tpu.memory_space<vmem>>, %arg13: memref<2x32x32xf32, #tpu.memory_space<vmem>>, %arg14: memref<2x1x32xf32, #tpu.memory_space<vmem>>, %arg15: memref<2x1x32xf32, #tpu.memory_space<vmem>>, %arg16: memref<2x1x32xf32, #tpu.memory_space<vmem>>, %arg17: memref<2x32x64xf32, #tpu.memory_space<vmem>>, %arg18: memref<2x1x64xf32, #tpu.memory_space<vmem>>, %arg19: memref<2x64x32xf32, #tpu.memory_space<vmem>>, %arg20: memref<2x1x32xf32, #tpu.memory_space<vmem>>, %arg21: memref<2x1x32xf32, #tpu.memory_space<vmem>>, %arg22: memref<2x1x32xf32, #tpu.memory_space<vmem>>, %arg23: memref<32x8xf32, #tpu.memory_space<vmem>>, %arg24: memref<1x8xf32, #tpu.memory_space<vmem>>, %arg25: memref<1x1x8xf32, #tpu.memory_space<vmem>>) attributes {dimension_semantics = [#tpu.dimension_semantics<parallel>], iteration_bounds = array<i64: 2>, scalar_prefetch = 0 : i64, scratch_operands = 0 : i64, tpu.core_type = #tpu.core_type<tc>, window_params = [{transform_indices = @transform_0, window_bounds = array<i64: 1, 8, 16>}, {pipeline_mode = #tpu.pipeline_mode<synchronous>, transform_indices = @transform_1, window_bounds = array<i64: 32, 32>}, {pipeline_mode = #tpu.pipeline_mode<synchronous>, transform_indices = @transform_2, window_bounds = array<i64: 32, 4>}, {pipeline_mode = #tpu.pipeline_mode<synchronous>, transform_indices = @transform_3, window_bounds = array<i64: 4, 32>}, {pipeline_mode = #tpu.pipeline_mode<synchronous>, transform_indices = @transform_4, window_bounds = array<i64: 16, 32>}, {pipeline_mode = #tpu.pipeline_mode<synchronous>, transform_indices = @transform_5, window_bounds = array<i64: 1, 32>}, {pipeline_mode = #tpu.pipeline_mode<synchronous>, transform_indices = @transform_6, window_bounds = array<i64: 2, 32, 32>}, {pipeline_mode = #tpu.pipeline_mode<synchronous>, transform_indices = @transform_7, window_bounds = array<i64: 2, 1, 32>}, {pipeline_mode = #tpu.pipeline_mode<synchronous>, transform_indices = @transform_8, window_bounds = array<i64: 2, 32, 32>}, {pipeline_mode = #tpu.pipeline_mode<synchronous>, transform_indices = @transform_9, window_bounds = array<i64: 2, 1, 32>}, {pipeline_mode = #tpu.pipeline_mode<synchronous>, transform_indices = @transform_10, window_bounds = array<i64: 2, 32, 32>}, {pipeline_mode = #tpu.pipeline_mode<synchronous>, transform_indices = @transform_11, window_bounds = array<i64: 2, 1, 32>}, {pipeline_mode = #tpu.pipeline_mode<synchronous>, transform_indices = @transform_12, window_bounds = array<i64: 2, 32, 32>}, {pipeline_mode = #tpu.pipeline_mode<synchronous>, transform_indices = @transform_13, window_bounds = array<i64: 2, 1, 32>}, {pipeline_mode = #tpu.pipeline_mode<synchronous>, transform_indices = @transform_14, window_bounds = array<i64: 2, 1, 32>}, {pipeline_mode = #tpu.pipeline_mode<synchronous>, transform_indices = @transform_15, window_bounds = array<i64: 2, 1, 32>}, {pipeline_mode = #tpu.pipeline_mode<synchronous>, transform_indices = @transform_16, window_bounds = array<i64: 2, 32, 64>}, {pipeline_mode = #tpu.pipeline_mode<synchronous>, transform_indices = @transform_17, window_bounds = array<i64: 2, 1, 64>}, {pipeline_mode = #tpu.pipeline_mode<synchronous>, transform_indices = @transform_18, window_bounds = array<i64: 2, 64, 32>}, {pipeline_mode = #tpu.pipeline_mode<synchronous>, transform_indices = @transform_19, window_bounds = array<i64: 2, 1, 32>}, {pipeline_mode = #tpu.pipeline_mode<synchronous>, transform_indices = @transform_20, window_bounds = array<i64: 2, 1, 32>}, {pipeline_mode = #tpu.pipeline_mode<synchronous>, transform_indices = @transform_21, window_bounds = array<i64: 2, 1, 32>}, {pipeline_mode = #tpu.pipeline_mode<synchronous>, transform_indices = @transform_22, window_bounds = array<i64: 32, 8>}, {pipeline_mode = #tpu.pipeline_mode<synchronous>, transform_indices = @transform_23, window_bounds = array<i64: 1, 8>}, {transform_indices = @transform_24, window_bounds = array<i64: 1, 1, 8>}]} {
    %c0 = arith.constant 0 : index
    %c0_0 = arith.constant 0 : index
    %c0_1 = arith.constant 0 : index
    %0 = vector.load %arg1[%c0, %c0_0, %c0_1] : memref<1x8x16xf32, #tpu.memory_space<vmem>>, vector<1x8x16xf32>
    %1 = vector.shape_cast %0 : vector<1x8x16xf32> to vector<8x16xf32>
    %c0_2 = arith.constant 0 : index
    %c0_3 = arith.constant 0 : index
    %2 = vector.load %arg5[%c0_2, %c0_3] : memref<16x32xf32, #tpu.memory_space<vmem>>, vector<16x32xf32>
    %cst = arith.constant dense<0.000000e+00> : vector<8x32xf32>
    %3 = tpu.matmul %1, %2, %cst {dimension_numbers = #tpu.dot_dimension_numbers<[1], [0], [0], [1], [0, 0, 1, 1], [], []>} : vector<8x16xf32>, vector<16x32xf32>, vector<8x32xf32> -> vector<8x32xf32>
    %c0_4 = arith.constant 0 : index
    %c0_5 = arith.constant 0 : index
    %4 = vector.load %arg6[%c0_4, %c0_5] : memref<1x32xf32, #tpu.memory_space<vmem>>, vector<1x32xf32>
    %5 = vector.broadcast %4 : vector<1x32xf32> to vector<8x32xf32>
    %6 = arith.addf %3, %5 : vector<8x32xf32>
    %c0_6 = arith.constant 0 : index
    %c0_7 = arith.constant 0 : index
    %7 = vector.load %arg2[%c0_6, %c0_7] : memref<32x32xf32, #tpu.memory_space<vmem>>, vector<32x32xf32>
    %c0_8 = arith.constant 0 : index
    %c0_9 = arith.constant 0 : index
    %8 = vector.load %arg3[%c0_8, %c0_9] : memref<32x4xf32, #tpu.memory_space<vmem>>, vector<32x4xf32>
    %c0_10 = arith.constant 0 : index
    %c0_11 = arith.constant 0 : index
    %9 = vector.load %arg4[%c0_10, %c0_11] : memref<4x32xf32, #tpu.memory_space<vmem>>, vector<4x32xf32>
    %c0_i32 = arith.constant 0 : i32
    %10 = arith.index_cast %c0_i32 : i32 to index
    %c0_12 = arith.constant 0 : index
    %c0_13 = arith.constant 0 : index
    %11 = vector.load %arg7[%10, %c0_12, %c0_13] : memref<2x32x32xf32, #tpu.memory_space<vmem>>, vector<1x32x32xf32>
    %12 = vector.shape_cast %11 : vector<1x32x32xf32> to vector<32x32xf32>
    %cst_14 = arith.constant dense<0.000000e+00> : vector<8x32xf32>
    %13 = tpu.matmul %6, %12, %cst_14 {dimension_numbers = #tpu.dot_dimension_numbers<[1], [0], [0], [1], [0, 0, 1, 1], [], []>} : vector<8x32xf32>, vector<32x32xf32>, vector<8x32xf32> -> vector<8x32xf32>
    %14 = arith.index_cast %c0_i32 : i32 to index
    %c0_15 = arith.constant 0 : index
    %c0_16 = arith.constant 0 : index
    %15 = vector.load %arg8[%14, %c0_15, %c0_16] : memref<2x1x32xf32, #tpu.memory_space<vmem>>, vector<1x1x32xf32>
    %16 = vector.shape_cast %15 : vector<1x1x32xf32> to vector<1x32xf32>
    %17 = vector.broadcast %16 : vector<1x32xf32> to vector<8x32xf32>
    %18 = arith.addf %13, %17 : vector<8x32xf32>
    %19 = arith.index_cast %c0_i32 : i32 to index
    %c0_17 = arith.constant 0 : index
    %c0_18 = arith.constant 0 : index
    %20 = vector.load %arg9[%19, %c0_17, %c0_18] : memref<2x32x32xf32, #tpu.memory_space<vmem>>, vector<1x32x32xf32>
    %21 = vector.shape_cast %20 : vector<1x32x32xf32> to vector<32x32xf32>
    %cst_19 = arith.constant dense<0.000000e+00> : vector<8x32xf32>
    %22 = tpu.matmul %6, %21, %cst_19 {dimension_numbers = #tpu.dot_dimension_numbers<[1], [0], [0], [1], [0, 0, 1, 1], [], []>} : vector<8x32xf32>, vector<32x32xf32>, vector<8x32xf32> -> vector<8x32xf32>
    %23 = arith.index_cast %c0_i32 : i32 to index
    %c0_20 = arith.constant 0 : index
    %c0_21 = arith.constant 0 : index
    %24 = vector.load %arg10[%23, %c0_20, %c0_21] : memref<2x1x32xf32, #tpu.memory_space<vmem>>, vector<1x1x32xf32>
    %25 = vector.shape_cast %24 : vector<1x1x32xf32> to vector<1x32xf32>
    %26 = vector.broadcast %25 : vector<1x32xf32> to vector<8x32xf32>
    %27 = arith.addf %22, %26 : vector<8x32xf32>
    %28 = arith.index_cast %c0_i32 : i32 to index
    %c0_22 = arith.constant 0 : index
    %c0_23 = arith.constant 0 : index
    %29 = vector.load %arg11[%28, %c0_22, %c0_23] : memref<2x32x32xf32, #tpu.memory_space<vmem>>, vector<1x32x32xf32>
    %30 = vector.shape_cast %29 : vector<1x32x32xf32> to vector<32x32xf32>
    %cst_24 = arith.constant dense<0.000000e+00> : vector<8x32xf32>
    %31 = tpu.matmul %6, %30, %cst_24 {dimension_numbers = #tpu.dot_dimension_numbers<[1], [0], [0], [1], [0, 0, 1, 1], [], []>} : vector<8x32xf32>, vector<32x32xf32>, vector<8x32xf32> -> vector<8x32xf32>
    %32 = arith.index_cast %c0_i32 : i32 to index
    %c0_25 = arith.constant 0 : index
    %c0_26 = arith.constant 0 : index
    %33 = vector.load %arg12[%32, %c0_25, %c0_26] : memref<2x1x32xf32, #tpu.memory_space<vmem>>, vector<1x1x32xf32>
    %34 = vector.shape_cast %33 : vector<1x1x32xf32> to vector<1x32xf32>
    %35 = vector.broadcast %34 : vector<1x32xf32> to vector<8x32xf32>
    %36 = arith.addf %31, %35 : vector<8x32xf32>
    %37 = tpu.concatenate %27, %27, %27, %27 in 0 : vector<8x32xf32>, vector<8x32xf32>, vector<8x32xf32>, vector<8x32xf32> -> vector<32x32xf32>
    %38 = arith.mulf %37, %7 : vector<32x32xf32>
    %39 = tpu.concatenate %36, %36, %36, %36 in 0 : vector<8x32xf32>, vector<8x32xf32>, vector<8x32xf32>, vector<8x32xf32> -> vector<32x32xf32>
    %40 = arith.mulf %39, %7 : vector<32x32xf32>
    "tpu.trace_start"() <{level = 10 : i32, message = "sd,rd->sr"}> : () -> ()
    %cst_27 = arith.constant dense<0.000000e+00> : vector<8x32xf32>
    %41 = tpu.matmul %18, %38, %cst_27 {dimension_numbers = #tpu.dot_dimension_numbers<[1], [1], [0], [0], [0, 0, 1, 0], [], []>} : vector<8x32xf32>, vector<32x32xf32>, vector<8x32xf32> -> vector<8x32xf32>
    "tpu.trace_stop"() : () -> ()
    %cst_28 = arith.constant 0.353553385 : f32
    %42 = vector.broadcast %cst_28 : f32 to vector<8x32xf32>
    %43 = arith.mulf %41, %42 : vector<8x32xf32>
    %cst_29 = arith.constant dense<0xFF800000> : vector<8xf32>
    %44 = vector.multi_reduction <maximumf>, %43, %cst_29 [1] : vector<8x32xf32> to vector<8xf32>
    %45 = vector.shape_cast %44 : vector<8xf32> to vector<8x1xf32>
    %46 = vector.broadcast %45 : vector<8x1xf32> to vector<8x32xf32>
    %47 = arith.subf %43, %46 : vector<8x32xf32>
    %48 = math.exp %47 : vector<8x32xf32>
    %cst_30 = arith.constant dense<0.000000e+00> : vector<8x4xf32>
    %49 = tpu.matmul %48, %8, %cst_30 {dimension_numbers = #tpu.dot_dimension_numbers<[1], [0], [0], [1], [0, 0, 1, 1], [], []>} : vector<8x32xf32>, vector<32x4xf32>, vector<8x4xf32> -> vector<8x4xf32>
    %50 = tpu.reciprocal %49 {approx = true} : vector<8x4xf32> -> vector<8x4xf32>
    %cst_31 = arith.constant dense<0.000000e+00> : vector<8x32xf32>
    %51 = tpu.matmul %50, %9, %cst_31 {dimension_numbers = #tpu.dot_dimension_numbers<[1], [0], [0], [1], [0, 0, 1, 1], [], []>} : vector<8x4xf32>, vector<4x32xf32>, vector<8x32xf32> -> vector<8x32xf32>
    %52 = arith.mulf %48, %51 : vector<8x32xf32>
    %cst_32 = arith.constant dense<0.000000e+00> : vector<8x32xf32>
    %53 = tpu.matmul %52, %40, %cst_32 {dimension_numbers = #tpu.dot_dimension_numbers<[1], [0], [0], [1], [0, 0, 1, 1], [], []>} : vector<8x32xf32>, vector<32x32xf32>, vector<8x32xf32> -> vector<8x32xf32>
    %54 = arith.index_cast %c0_i32 : i32 to index
    %c0_33 = arith.constant 0 : index
    %c0_34 = arith.constant 0 : index
    %55 = vector.load %arg13[%54, %c0_33, %c0_34] : memref<2x32x32xf32, #tpu.memory_space<vmem>>, vector<1x32x32xf32>
    %56 = vector.shape_cast %55 : vector<1x32x32xf32> to vector<32x32xf32>
    %cst_35 = arith.constant dense<0.000000e+00> : vector<8x32xf32>
    %57 = tpu.matmul %53, %56, %cst_35 {dimension_numbers = #tpu.dot_dimension_numbers<[1], [0], [0], [1], [0, 0, 1, 1], [], []>} : vector<8x32xf32>, vector<32x32xf32>, vector<8x32xf32> -> vector<8x32xf32>
    %58 = arith.index_cast %c0_i32 : i32 to index
    %c0_36 = arith.constant 0 : index
    %c0_37 = arith.constant 0 : index
    %59 = vector.load %arg14[%58, %c0_36, %c0_37] : memref<2x1x32xf32, #tpu.memory_space<vmem>>, vector<1x1x32xf32>
    %60 = vector.shape_cast %59 : vector<1x1x32xf32> to vector<1x32xf32>
    %61 = vector.broadcast %60 : vector<1x32xf32> to vector<8x32xf32>
    %62 = arith.addf %57, %61 : vector<8x32xf32>
    %63 = arith.addf %6, %62 : vector<8x32xf32>
    %64 = arith.index_cast %c0_i32 : i32 to index
    %c0_38 = arith.constant 0 : index
    %c0_39 = arith.constant 0 : index
    %65 = vector.load %arg15[%64, %c0_38, %c0_39] : memref<2x1x32xf32, #tpu.memory_space<vmem>>, vector<1x1x32xf32>
    %66 = vector.shape_cast %65 : vector<1x1x32xf32> to vector<1x32xf32>
    %67 = arith.index_cast %c0_i32 : i32 to index
    %c0_40 = arith.constant 0 : index
    %c0_41 = arith.constant 0 : index
    %68 = vector.load %arg16[%67, %c0_40, %c0_41] : memref<2x1x32xf32, #tpu.memory_space<vmem>>, vector<1x1x32xf32>
    %69 = vector.shape_cast %68 : vector<1x1x32xf32> to vector<1x32xf32>
    %cst_42 = arith.constant dense<0.000000e+00> : vector<8xf32>
    %70 = vector.multi_reduction <add>, %63, %cst_42 [1] : vector<8x32xf32> to vector<8xf32>
    %71 = vector.shape_cast %70 : vector<8xf32> to vector<8x1xf32>
    %cst_43 = arith.constant 3.200000e+01 : f32
    %72 = vector.broadcast %cst_43 : f32 to vector<8x1xf32>
    %73 = arith.divf %71, %72 : vector<8x1xf32>
    %74 = vector.broadcast %73 : vector<8x1xf32> to vector<8x32xf32>
    %75 = arith.subf %63, %74 : vector<8x32xf32>
    %76 = arith.mulf %75, %75 : vector<8x32xf32>
    %cst_44 = arith.constant dense<0.000000e+00> : vector<8xf32>
    %77 = vector.multi_reduction <add>, %76, %cst_44 [1] : vector<8x32xf32> to vector<8xf32>
    %78 = vector.shape_cast %77 : vector<8xf32> to vector<8x1xf32>
    %cst_45 = arith.constant 3.200000e+01 : f32
    %79 = vector.broadcast %cst_45 : f32 to vector<8x1xf32>
    %80 = arith.divf %78, %79 : vector<8x1xf32>
    %cst_46 = arith.constant 9.99999974E-6 : f32
    %81 = vector.broadcast %cst_46 : f32 to vector<8x1xf32>
    %82 = arith.addf %80, %81 : vector<8x1xf32>
    %83 = math.rsqrt %82 : vector<8x1xf32>
    %84 = vector.broadcast %83 : vector<8x1xf32> to vector<8x32xf32>
    %85 = arith.mulf %75, %84 : vector<8x32xf32>
    %86 = vector.broadcast %66 : vector<1x32xf32> to vector<8x32xf32>
    %87 = arith.mulf %85, %86 : vector<8x32xf32>
    %88 = vector.broadcast %69 : vector<1x32xf32> to vector<8x32xf32>
    %89 = arith.addf %87, %88 : vector<8x32xf32>
    %90 = arith.index_cast %c0_i32 : i32 to index
    %c0_47 = arith.constant 0 : index
    %c0_48 = arith.constant 0 : index
    %91 = vector.load %arg17[%90, %c0_47, %c0_48] : memref<2x32x64xf32, #tpu.memory_space<vmem>>, vector<1x32x64xf32>
    %92 = vector.shape_cast %91 : vector<1x32x64xf32> to vector<32x64xf32>
    %cst_49 = arith.constant dense<0.000000e+00> : vector<8x64xf32>
    %93 = tpu.matmul %89, %92, %cst_49 {dimension_numbers = #tpu.dot_dimension_numbers<[1], [0], [0], [1], [0, 0, 1, 1], [], []>} : vector<8x32xf32>, vector<32x64xf32>, vector<8x64xf32> -> vector<8x64xf32>
    %94 = arith.index_cast %c0_i32 : i32 to index
    %c0_50 = arith.constant 0 : index
    %c0_51 = arith.constant 0 : index
    %95 = vector.load %arg18[%94, %c0_50, %c0_51] : memref<2x1x64xf32, #tpu.memory_space<vmem>>, vector<1x1x64xf32>
    %96 = vector.shape_cast %95 : vector<1x1x64xf32> to vector<1x64xf32>
    %97 = vector.broadcast %96 : vector<1x64xf32> to vector<8x64xf32>
    %98 = arith.addf %93, %97 : vector<8x64xf32>
    %cst_52 = arith.constant 0.000000e+00 : f32
    %99 = vector.broadcast %cst_52 : f32 to vector<8x64xf32>
    %100 = arith.maximumf %98, %99 : vector<8x64xf32>
    %101 = arith.index_cast %c0_i32 : i32 to index
    %c0_53 = arith.constant 0 : index
    %c0_54 = arith.constant 0 : index
    %102 = vector.load %arg19[%101, %c0_53, %c0_54] : memref<2x64x32xf32, #tpu.memory_space<vmem>>, vector<1x64x32xf32>
    %103 = vector.shape_cast %102 : vector<1x64x32xf32> to vector<64x32xf32>
    %cst_55 = arith.constant dense<0.000000e+00> : vector<8x32xf32>
    %104 = tpu.matmul %100, %103, %cst_55 {dimension_numbers = #tpu.dot_dimension_numbers<[1], [0], [0], [1], [0, 0, 1, 1], [], []>} : vector<8x64xf32>, vector<64x32xf32>, vector<8x32xf32> -> vector<8x32xf32>
    %105 = arith.index_cast %c0_i32 : i32 to index
    %c0_56 = arith.constant 0 : index
    %c0_57 = arith.constant 0 : index
    %106 = vector.load %arg20[%105, %c0_56, %c0_57] : memref<2x1x32xf32, #tpu.memory_space<vmem>>, vector<1x1x32xf32>
    %107 = vector.shape_cast %106 : vector<1x1x32xf32> to vector<1x32xf32>
    %108 = vector.broadcast %107 : vector<1x32xf32> to vector<8x32xf32>
    %109 = arith.addf %104, %108 : vector<8x32xf32>
    %110 = arith.addf %89, %109 : vector<8x32xf32>
    %111 = arith.index_cast %c0_i32 : i32 to index
    %c0_58 = arith.constant 0 : index
    %c0_59 = arith.constant 0 : index
    %112 = vector.load %arg21[%111, %c0_58, %c0_59] : memref<2x1x32xf32, #tpu.memory_space<vmem>>, vector<1x1x32xf32>
    %113 = vector.shape_cast %112 : vector<1x1x32xf32> to vector<1x32xf32>
    %114 = arith.index_cast %c0_i32 : i32 to index
    %c0_60 = arith.constant 0 : index
    %c0_61 = arith.constant 0 : index
    %115 = vector.load %arg22[%114, %c0_60, %c0_61] : memref<2x1x32xf32, #tpu.memory_space<vmem>>, vector<1x1x32xf32>
    %116 = vector.shape_cast %115 : vector<1x1x32xf32> to vector<1x32xf32>
    %cst_62 = arith.constant dense<0.000000e+00> : vector<8xf32>
    %117 = vector.multi_reduction <add>, %110, %cst_62 [1] : vector<8x32xf32> to vector<8xf32>
    %118 = vector.shape_cast %117 : vector<8xf32> to vector<8x1xf32>
    %cst_63 = arith.constant 3.200000e+01 : f32
    %119 = vector.broadcast %cst_63 : f32 to vector<8x1xf32>
    %120 = arith.divf %118, %119 : vector<8x1xf32>
    %121 = vector.broadcast %120 : vector<8x1xf32> to vector<8x32xf32>
    %122 = arith.subf %110, %121 : vector<8x32xf32>
    %123 = arith.mulf %122, %122 : vector<8x32xf32>
    %cst_64 = arith.constant dense<0.000000e+00> : vector<8xf32>
    %124 = vector.multi_reduction <add>, %123, %cst_64 [1] : vector<8x32xf32> to vector<8xf32>
    %125 = vector.shape_cast %124 : vector<8xf32> to vector<8x1xf32>
    %cst_65 = arith.constant 3.200000e+01 : f32
    %126 = vector.broadcast %cst_65 : f32 to vector<8x1xf32>
    %127 = arith.divf %125, %126 : vector<8x1xf32>
    %cst_66 = arith.constant 9.99999974E-6 : f32
    %128 = vector.broadcast %cst_66 : f32 to vector<8x1xf32>
    %129 = arith.addf %127, %128 : vector<8x1xf32>
    %130 = math.rsqrt %129 : vector<8x1xf32>
    %131 = vector.broadcast %130 : vector<8x1xf32> to vector<8x32xf32>
    %132 = arith.mulf %122, %131 : vector<8x32xf32>
    %133 = vector.broadcast %113 : vector<1x32xf32> to vector<8x32xf32>
    %134 = arith.mulf %132, %133 : vector<8x32xf32>
    %135 = vector.broadcast %116 : vector<1x32xf32> to vector<8x32xf32>
    %136 = arith.addf %134, %135 : vector<8x32xf32>
    %c1_i32 = arith.constant 1 : i32
    %137 = arith.index_cast %c1_i32 : i32 to index
    %c0_67 = arith.constant 0 : index
    %c0_68 = arith.constant 0 : index
    %138 = vector.load %arg7[%137, %c0_67, %c0_68] : memref<2x32x32xf32, #tpu.memory_space<vmem>>, vector<1x32x32xf32>
    %139 = vector.shape_cast %138 : vector<1x32x32xf32> to vector<32x32xf32>
    %cst_69 = arith.constant dense<0.000000e+00> : vector<8x32xf32>
    %140 = tpu.matmul %136, %139, %cst_69 {dimension_numbers = #tpu.dot_dimension_numbers<[1], [0], [0], [1], [0, 0, 1, 1], [], []>} : vector<8x32xf32>, vector<32x32xf32>, vector<8x32xf32> -> vector<8x32xf32>
    %141 = arith.index_cast %c1_i32 : i32 to index
    %c0_70 = arith.constant 0 : index
    %c0_71 = arith.constant 0 : index
    %142 = vector.load %arg8[%141, %c0_70, %c0_71] : memref<2x1x32xf32, #tpu.memory_space<vmem>>, vector<1x1x32xf32>
    %143 = vector.shape_cast %142 : vector<1x1x32xf32> to vector<1x32xf32>
    %144 = vector.broadcast %143 : vector<1x32xf32> to vector<8x32xf32>
    %145 = arith.addf %140, %144 : vector<8x32xf32>
    %146 = arith.index_cast %c1_i32 : i32 to index
    %c0_72 = arith.constant 0 : index
    %c0_73 = arith.constant 0 : index
    %147 = vector.load %arg9[%146, %c0_72, %c0_73] : memref<2x32x32xf32, #tpu.memory_space<vmem>>, vector<1x32x32xf32>
    %148 = vector.shape_cast %147 : vector<1x32x32xf32> to vector<32x32xf32>
    %cst_74 = arith.constant dense<0.000000e+00> : vector<8x32xf32>
    %149 = tpu.matmul %136, %148, %cst_74 {dimension_numbers = #tpu.dot_dimension_numbers<[1], [0], [0], [1], [0, 0, 1, 1], [], []>} : vector<8x32xf32>, vector<32x32xf32>, vector<8x32xf32> -> vector<8x32xf32>
    %150 = arith.index_cast %c1_i32 : i32 to index
    %c0_75 = arith.constant 0 : index
    %c0_76 = arith.constant 0 : index
    %151 = vector.load %arg10[%150, %c0_75, %c0_76] : memref<2x1x32xf32, #tpu.memory_space<vmem>>, vector<1x1x32xf32>
    %152 = vector.shape_cast %151 : vector<1x1x32xf32> to vector<1x32xf32>
    %153 = vector.broadcast %152 : vector<1x32xf32> to vector<8x32xf32>
    %154 = arith.addf %149, %153 : vector<8x32xf32>
    %155 = arith.index_cast %c1_i32 : i32 to index
    %c0_77 = arith.constant 0 : index
    %c0_78 = arith.constant 0 : index
    %156 = vector.load %arg11[%155, %c0_77, %c0_78] : memref<2x32x32xf32, #tpu.memory_space<vmem>>, vector<1x32x32xf32>
    %157 = vector.shape_cast %156 : vector<1x32x32xf32> to vector<32x32xf32>
    %cst_79 = arith.constant dense<0.000000e+00> : vector<8x32xf32>
    %158 = tpu.matmul %136, %157, %cst_79 {dimension_numbers = #tpu.dot_dimension_numbers<[1], [0], [0], [1], [0, 0, 1, 1], [], []>} : vector<8x32xf32>, vector<32x32xf32>, vector<8x32xf32> -> vector<8x32xf32>
    %159 = arith.index_cast %c1_i32 : i32 to index
    %c0_80 = arith.constant 0 : index
    %c0_81 = arith.constant 0 : index
    %160 = vector.load %arg12[%159, %c0_80, %c0_81] : memref<2x1x32xf32, #tpu.memory_space<vmem>>, vector<1x1x32xf32>
    %161 = vector.shape_cast %160 : vector<1x1x32xf32> to vector<1x32xf32>
    %162 = vector.broadcast %161 : vector<1x32xf32> to vector<8x32xf32>
    %163 = arith.addf %158, %162 : vector<8x32xf32>
    %164 = tpu.concatenate %154, %154, %154, %154 in 0 : vector<8x32xf32>, vector<8x32xf32>, vector<8x32xf32>, vector<8x32xf32> -> vector<32x32xf32>
    %165 = arith.mulf %164, %7 : vector<32x32xf32>
    %166 = tpu.concatenate %163, %163, %163, %163 in 0 : vector<8x32xf32>, vector<8x32xf32>, vector<8x32xf32>, vector<8x32xf32> -> vector<32x32xf32>
    %167 = arith.mulf %166, %7 : vector<32x32xf32>
    "tpu.trace_start"() <{level = 10 : i32, message = "sd,rd->sr"}> : () -> ()
    %cst_82 = arith.constant dense<0.000000e+00> : vector<8x32xf32>
    %168 = tpu.matmul %145, %165, %cst_82 {dimension_numbers = #tpu.dot_dimension_numbers<[1], [1], [0], [0], [0, 0, 1, 0], [], []>} : vector<8x32xf32>, vector<32x32xf32>, vector<8x32xf32> -> vector<8x32xf32>
    "tpu.trace_stop"() : () -> ()
    %cst_83 = arith.constant 0.353553385 : f32
    %169 = vector.broadcast %cst_83 : f32 to vector<8x32xf32>
    %170 = arith.mulf %168, %169 : vector<8x32xf32>
    %cst_84 = arith.constant dense<0xFF800000> : vector<8xf32>
    %171 = vector.multi_reduction <maximumf>, %170, %cst_84 [1] : vector<8x32xf32> to vector<8xf32>
    %172 = vector.shape_cast %171 : vector<8xf32> to vector<8x1xf32>
    %173 = vector.broadcast %172 : vector<8x1xf32> to vector<8x32xf32>
    %174 = arith.subf %170, %173 : vector<8x32xf32>
    %175 = math.exp %174 : vector<8x32xf32>
    %cst_85 = arith.constant dense<0.000000e+00> : vector<8x4xf32>
    %176 = tpu.matmul %175, %8, %cst_85 {dimension_numbers = #tpu.dot_dimension_numbers<[1], [0], [0], [1], [0, 0, 1, 1], [], []>} : vector<8x32xf32>, vector<32x4xf32>, vector<8x4xf32> -> vector<8x4xf32>
    %177 = tpu.reciprocal %176 {approx = true} : vector<8x4xf32> -> vector<8x4xf32>
    %cst_86 = arith.constant dense<0.000000e+00> : vector<8x32xf32>
    %178 = tpu.matmul %177, %9, %cst_86 {dimension_numbers = #tpu.dot_dimension_numbers<[1], [0], [0], [1], [0, 0, 1, 1], [], []>} : vector<8x4xf32>, vector<4x32xf32>, vector<8x32xf32> -> vector<8x32xf32>
    %179 = arith.mulf %175, %178 : vector<8x32xf32>
    %cst_87 = arith.constant dense<0.000000e+00> : vector<8x32xf32>
    %180 = tpu.matmul %179, %167, %cst_87 {dimension_numbers = #tpu.dot_dimension_numbers<[1], [0], [0], [1], [0, 0, 1, 1], [], []>} : vector<8x32xf32>, vector<32x32xf32>, vector<8x32xf32> -> vector<8x32xf32>
    %181 = arith.index_cast %c1_i32 : i32 to index
    %c0_88 = arith.constant 0 : index
    %c0_89 = arith.constant 0 : index
    %182 = vector.load %arg13[%181, %c0_88, %c0_89] : memref<2x32x32xf32, #tpu.memory_space<vmem>>, vector<1x32x32xf32>
    %183 = vector.shape_cast %182 : vector<1x32x32xf32> to vector<32x32xf32>
    %cst_90 = arith.constant dense<0.000000e+00> : vector<8x32xf32>
    %184 = tpu.matmul %180, %183, %cst_90 {dimension_numbers = #tpu.dot_dimension_numbers<[1], [0], [0], [1], [0, 0, 1, 1], [], []>} : vector<8x32xf32>, vector<32x32xf32>, vector<8x32xf32> -> vector<8x32xf32>
    %185 = arith.index_cast %c1_i32 : i32 to index
    %c0_91 = arith.constant 0 : index
    %c0_92 = arith.constant 0 : index
    %186 = vector.load %arg14[%185, %c0_91, %c0_92] : memref<2x1x32xf32, #tpu.memory_space<vmem>>, vector<1x1x32xf32>
    %187 = vector.shape_cast %186 : vector<1x1x32xf32> to vector<1x32xf32>
    %188 = vector.broadcast %187 : vector<1x32xf32> to vector<8x32xf32>
    %189 = arith.addf %184, %188 : vector<8x32xf32>
    %190 = arith.addf %136, %189 : vector<8x32xf32>
    %191 = arith.index_cast %c1_i32 : i32 to index
    %c0_93 = arith.constant 0 : index
    %c0_94 = arith.constant 0 : index
    %192 = vector.load %arg15[%191, %c0_93, %c0_94] : memref<2x1x32xf32, #tpu.memory_space<vmem>>, vector<1x1x32xf32>
    %193 = vector.shape_cast %192 : vector<1x1x32xf32> to vector<1x32xf32>
    %194 = arith.index_cast %c1_i32 : i32 to index
    %c0_95 = arith.constant 0 : index
    %c0_96 = arith.constant 0 : index
    %195 = vector.load %arg16[%194, %c0_95, %c0_96] : memref<2x1x32xf32, #tpu.memory_space<vmem>>, vector<1x1x32xf32>
    %196 = vector.shape_cast %195 : vector<1x1x32xf32> to vector<1x32xf32>
    %cst_97 = arith.constant dense<0.000000e+00> : vector<8xf32>
    %197 = vector.multi_reduction <add>, %190, %cst_97 [1] : vector<8x32xf32> to vector<8xf32>
    %198 = vector.shape_cast %197 : vector<8xf32> to vector<8x1xf32>
    %cst_98 = arith.constant 3.200000e+01 : f32
    %199 = vector.broadcast %cst_98 : f32 to vector<8x1xf32>
    %200 = arith.divf %198, %199 : vector<8x1xf32>
    %201 = vector.broadcast %200 : vector<8x1xf32> to vector<8x32xf32>
    %202 = arith.subf %190, %201 : vector<8x32xf32>
    %203 = arith.mulf %202, %202 : vector<8x32xf32>
    %cst_99 = arith.constant dense<0.000000e+00> : vector<8xf32>
    %204 = vector.multi_reduction <add>, %203, %cst_99 [1] : vector<8x32xf32> to vector<8xf32>
    %205 = vector.shape_cast %204 : vector<8xf32> to vector<8x1xf32>
    %cst_100 = arith.constant 3.200000e+01 : f32
    %206 = vector.broadcast %cst_100 : f32 to vector<8x1xf32>
    %207 = arith.divf %205, %206 : vector<8x1xf32>
    %cst_101 = arith.constant 9.99999974E-6 : f32
    %208 = vector.broadcast %cst_101 : f32 to vector<8x1xf32>
    %209 = arith.addf %207, %208 : vector<8x1xf32>
    %210 = math.rsqrt %209 : vector<8x1xf32>
    %211 = vector.broadcast %210 : vector<8x1xf32> to vector<8x32xf32>
    %212 = arith.mulf %202, %211 : vector<8x32xf32>
    %213 = vector.broadcast %193 : vector<1x32xf32> to vector<8x32xf32>
    %214 = arith.mulf %212, %213 : vector<8x32xf32>
    %215 = vector.broadcast %196 : vector<1x32xf32> to vector<8x32xf32>
    %216 = arith.addf %214, %215 : vector<8x32xf32>
    %217 = arith.index_cast %c1_i32 : i32 to index
    %c0_102 = arith.constant 0 : index
    %c0_103 = arith.constant 0 : index
    %218 = vector.load %arg17[%217, %c0_102, %c0_103] : memref<2x32x64xf32, #tpu.memory_space<vmem>>, vector<1x32x64xf32>
    %219 = vector.shape_cast %218 : vector<1x32x64xf32> to vector<32x64xf32>
    %cst_104 = arith.constant dense<0.000000e+00> : vector<8x64xf32>
    %220 = tpu.matmul %216, %219, %cst_104 {dimension_numbers = #tpu.dot_dimension_numbers<[1], [0], [0], [1], [0, 0, 1, 1], [], []>} : vector<8x32xf32>, vector<32x64xf32>, vector<8x64xf32> -> vector<8x64xf32>
    %221 = arith.index_cast %c1_i32 : i32 to index
    %c0_105 = arith.constant 0 : index
    %c0_106 = arith.constant 0 : index
    %222 = vector.load %arg18[%221, %c0_105, %c0_106] : memref<2x1x64xf32, #tpu.memory_space<vmem>>, vector<1x1x64xf32>
    %223 = vector.shape_cast %222 : vector<1x1x64xf32> to vector<1x64xf32>
    %224 = vector.broadcast %223 : vector<1x64xf32> to vector<8x64xf32>
    %225 = arith.addf %220, %224 : vector<8x64xf32>
    %cst_107 = arith.constant 0.000000e+00 : f32
    %226 = vector.broadcast %cst_107 : f32 to vector<8x64xf32>
    %227 = arith.maximumf %225, %226 : vector<8x64xf32>
    %228 = arith.index_cast %c1_i32 : i32 to index
    %c0_108 = arith.constant 0 : index
    %c0_109 = arith.constant 0 : index
    %229 = vector.load %arg19[%228, %c0_108, %c0_109] : memref<2x64x32xf32, #tpu.memory_space<vmem>>, vector<1x64x32xf32>
    %230 = vector.shape_cast %229 : vector<1x64x32xf32> to vector<64x32xf32>
    %cst_110 = arith.constant dense<0.000000e+00> : vector<8x32xf32>
    %231 = tpu.matmul %227, %230, %cst_110 {dimension_numbers = #tpu.dot_dimension_numbers<[1], [0], [0], [1], [0, 0, 1, 1], [], []>} : vector<8x64xf32>, vector<64x32xf32>, vector<8x32xf32> -> vector<8x32xf32>
    %232 = arith.index_cast %c1_i32 : i32 to index
    %c0_111 = arith.constant 0 : index
    %c0_112 = arith.constant 0 : index
    %233 = vector.load %arg20[%232, %c0_111, %c0_112] : memref<2x1x32xf32, #tpu.memory_space<vmem>>, vector<1x1x32xf32>
    %234 = vector.shape_cast %233 : vector<1x1x32xf32> to vector<1x32xf32>
    %235 = vector.broadcast %234 : vector<1x32xf32> to vector<8x32xf32>
    %236 = arith.addf %231, %235 : vector<8x32xf32>
    %237 = arith.addf %216, %236 : vector<8x32xf32>
    %238 = arith.index_cast %c1_i32 : i32 to index
    %c0_113 = arith.constant 0 : index
    %c0_114 = arith.constant 0 : index
    %239 = vector.load %arg21[%238, %c0_113, %c0_114] : memref<2x1x32xf32, #tpu.memory_space<vmem>>, vector<1x1x32xf32>
    %240 = vector.shape_cast %239 : vector<1x1x32xf32> to vector<1x32xf32>
    %241 = arith.index_cast %c1_i32 : i32 to index
    %c0_115 = arith.constant 0 : index
    %c0_116 = arith.constant 0 : index
    %242 = vector.load %arg22[%241, %c0_115, %c0_116] : memref<2x1x32xf32, #tpu.memory_space<vmem>>, vector<1x1x32xf32>
    %243 = vector.shape_cast %242 : vector<1x1x32xf32> to vector<1x32xf32>
    %cst_117 = arith.constant dense<0.000000e+00> : vector<8xf32>
    %244 = vector.multi_reduction <add>, %237, %cst_117 [1] : vector<8x32xf32> to vector<8xf32>
    %245 = vector.shape_cast %244 : vector<8xf32> to vector<8x1xf32>
    %cst_118 = arith.constant 3.200000e+01 : f32
    %246 = vector.broadcast %cst_118 : f32 to vector<8x1xf32>
    %247 = arith.divf %245, %246 : vector<8x1xf32>
    %248 = vector.broadcast %247 : vector<8x1xf32> to vector<8x32xf32>
    %249 = arith.subf %237, %248 : vector<8x32xf32>
    %250 = arith.mulf %249, %249 : vector<8x32xf32>
    %cst_119 = arith.constant dense<0.000000e+00> : vector<8xf32>
    %251 = vector.multi_reduction <add>, %250, %cst_119 [1] : vector<8x32xf32> to vector<8xf32>
    %252 = vector.shape_cast %251 : vector<8xf32> to vector<8x1xf32>
    %cst_120 = arith.constant 3.200000e+01 : f32
    %253 = vector.broadcast %cst_120 : f32 to vector<8x1xf32>
    %254 = arith.divf %252, %253 : vector<8x1xf32>
    %cst_121 = arith.constant 9.99999974E-6 : f32
    %255 = vector.broadcast %cst_121 : f32 to vector<8x1xf32>
    %256 = arith.addf %254, %255 : vector<8x1xf32>
    %257 = math.rsqrt %256 : vector<8x1xf32>
    %258 = vector.broadcast %257 : vector<8x1xf32> to vector<8x32xf32>
    %259 = arith.mulf %249, %258 : vector<8x32xf32>
    %260 = vector.broadcast %240 : vector<1x32xf32> to vector<8x32xf32>
    %261 = arith.mulf %259, %260 : vector<8x32xf32>
    %262 = vector.broadcast %243 : vector<1x32xf32> to vector<8x32xf32>
    %263 = arith.addf %261, %262 : vector<8x32xf32>
    %c2_i32 = arith.constant 2 : i32
    %264 = vector.extract_strided_slice %263 {offsets = [7, 0], sizes = [1, 32], strides = [1, 1]} : vector<8x32xf32> to vector<1x32xf32>
    %c0_122 = arith.constant 0 : index
    %c0_123 = arith.constant 0 : index
    %265 = vector.load %arg23[%c0_122, %c0_123] : memref<32x8xf32, #tpu.memory_space<vmem>>, vector<32x8xf32>
    %cst_124 = arith.constant dense<0.000000e+00> : vector<1x8xf32>
    %266 = tpu.matmul %264, %265, %cst_124 {dimension_numbers = #tpu.dot_dimension_numbers<[1], [0], [0], [1], [0, 0, 1, 1], [], []>} : vector<1x32xf32>, vector<32x8xf32>, vector<1x8xf32> -> vector<1x8xf32>
    %c0_125 = arith.constant 0 : index
    %c0_126 = arith.constant 0 : index
    %267 = vector.load %arg24[%c0_125, %c0_126] : memref<1x8xf32, #tpu.memory_space<vmem>>, vector<1x8xf32>
    %268 = arith.addf %266, %267 : vector<1x8xf32>
    %cst_127 = arith.constant dense<0xFF800000> : vector<1xf32>
    %269 = vector.multi_reduction <maximumf>, %268, %cst_127 [1] : vector<1x8xf32> to vector<1xf32>
    %270 = vector.shape_cast %269 : vector<1xf32> to vector<1x1xf32>
    %271 = vector.broadcast %270 : vector<1x1xf32> to vector<1x8xf32>
    %272 = arith.subf %268, %271 : vector<1x8xf32>
    %273 = math.exp %272 : vector<1x8xf32>
    %cst_128 = arith.constant dense<0.000000e+00> : vector<1xf32>
    %274 = vector.multi_reduction <add>, %273, %cst_128 [1] : vector<1x8xf32> to vector<1xf32>
    %275 = vector.shape_cast %274 : vector<1xf32> to vector<1x1xf32>
    %276 = vector.broadcast %275 : vector<1x1xf32> to vector<1x8xf32>
    %277 = arith.divf %273, %276 : vector<1x8xf32>
    %c0_129 = arith.constant 0 : index
    %c0_130 = arith.constant 0 : index
    %c0_131 = arith.constant 0 : index
    %278 = vector.load %arg25[%c0_129, %c0_130, %c0_131] : memref<1x1x8xf32, #tpu.memory_space<vmem>>, vector<1x1x8xf32>
    %279 = vector.shape_cast %278 : vector<1x1x8xf32> to vector<1x8xf32>
    %280 = vector.shape_cast %277 : vector<1x8xf32> to vector<1x1x8xf32>
    tpu.vector_store %arg25[%c0_129, %c0_130, %c0_131], %280 {strides = array<i32>} : memref<1x1x8xf32, #tpu.memory_space<vmem>>, vector<1x1x8xf32>,
    return
  }
  func.func @transform_0(%arg0: i32) -> (i32, i32, i32) {
    %c0_i32 = arith.constant 0 : i32
    %c0_i32_0 = arith.constant 0 : i32
    %c0_i32_1 = arith.constant 0 : i32
    return %arg0, %c0_i32, %c0_i32_0 : i32, i32, i32
  }
  func.func @transform_1(%arg0: i32) -> (i32, i32) {
    %c0_i32 = arith.constant 0 : i32
    %c0_i32_0 = arith.constant 0 : i32
    %c0_i32_1 = arith.constant 0 : i32
    return %c0_i32, %c0_i32_0 : i32, i32
  }
  func.func @transform_2(%arg0: i32) -> (i32, i32) {
    %c0_i32 = arith.constant 0 : i32
    %c0_i32_0 = arith.constant 0 : i32
    %c0_i32_1 = arith.constant 0 : i32
    return %c0_i32, %c0_i32_0 : i32, i32
  }
  func.func @transform_3(%arg0: i32) -> (i32, i32) {
    %c0_i32 = arith.constant 0 : i32
    %c0_i32_0 = arith.constant 0 : i32
    %c0_i32_1 = arith.constant 0 : i32
    return %c0_i32, %c0_i32_0 : i32, i32
  }
  func.func @transform_4(%arg0: i32) -> (i32, i32) {
    %c0_i32 = arith.constant 0 : i32
    %c0_i32_0 = arith.constant 0 : i32
    %c0_i32_1 = arith.constant 0 : i32
    return %c0_i32, %c0_i32_0 : i32, i32
  }
  func.func @transform_5(%arg0: i32) -> (i32, i32) {
    %c0_i32 = arith.constant 0 : i32
    %c0_i32_0 = arith.constant 0 : i32
    %c0_i32_1 = arith.constant 0 : i32
    return %c0_i32, %c0_i32_0 : i32, i32
  }
  func.func @transform_6(%arg0: i32) -> (i32, i32, i32) {
    %c0_i32 = arith.constant 0 : i32
    %c0_i32_0 = arith.constant 0 : i32
    %c0_i32_1 = arith.constant 0 : i32
    %c0_i32_2 = arith.constant 0 : i32
    return %c0_i32, %c0_i32_0, %c0_i32_1 : i32, i32, i32
  }
  func.func @transform_7(%arg0: i32) -> (i32, i32, i32) {
    %c0_i32 = arith.constant 0 : i32
    %c0_i32_0 = arith.constant 0 : i32
    %c0_i32_1 = arith.constant 0 : i32
    %c0_i32_2 = arith.constant 0 : i32
    return %c0_i32, %c0_i32_0, %c0_i32_1 : i32, i32, i32
  }
  func.func @transform_8(%arg0: i32) -> (i32, i32, i32) {
    %c0_i32 = arith.constant 0 : i32
    %c0_i32_0 = arith.constant 0 : i32
    %c0_i32_1 = arith.constant 0 : i32
    %c0_i32_2 = arith.constant 0 : i32
    return %c0_i32, %c0_i32_0, %c0_i32_1 : i32, i32, i32
  }
  func.func @transform_9(%arg0: i32) -> (i32, i32, i32) {
    %c0_i32 = arith.constant 0 : i32
    %c0_i32_0 = arith.constant 0 : i32
    %c0_i32_1 = arith.constant 0 : i32
    %c0_i32_2 = arith.constant 0 : i32
    return %c0_i32, %c0_i32_0, %c0_i32_1 : i32, i32, i32
  }
  func.func @transform_10(%arg0: i32) -> (i32, i32, i32) {
    %c0_i32 = arith.constant 0 : i32
    %c0_i32_0 = arith.constant 0 : i32
    %c0_i32_1 = arith.constant 0 : i32
    %c0_i32_2 = arith.constant 0 : i32
    return %c0_i32, %c0_i32_0, %c0_i32_1 : i32, i32, i32
  }
  func.func @transform_11(%arg0: i32) -> (i32, i32, i32) {
    %c0_i32 = arith.constant 0 : i32
    %c0_i32_0 = arith.constant 0 : i32
    %c0_i32_1 = arith.constant 0 : i32
    %c0_i32_2 = arith.constant 0 : i32
    return %c0_i32, %c0_i32_0, %c0_i32_1 : i32, i32, i32
  }
  func.func @transform_12(%arg0: i32) -> (i32, i32, i32) {
    %c0_i32 = arith.constant 0 : i32
    %c0_i32_0 = arith.constant 0 : i32
    %c0_i32_1 = arith.constant 0 : i32
    %c0_i32_2 = arith.constant 0 : i32
    return %c0_i32, %c0_i32_0, %c0_i32_1 : i32, i32, i32
  }
  func.func @transform_13(%arg0: i32) -> (i32, i32, i32) {
    %c0_i32 = arith.constant 0 : i32
    %c0_i32_0 = arith.constant 0 : i32
    %c0_i32_1 = arith.constant 0 : i32
    %c0_i32_2 = arith.constant 0 : i32
    return %c0_i32, %c0_i32_0, %c0_i32_1 : i32, i32, i32
  }
  func.func @transform_14(%arg0: i32) -> (i32, i32, i32) {
    %c0_i32 = arith.constant 0 : i32
    %c0_i32_0 = arith.constant 0 : i32
    %c0_i32_1 = arith.constant 0 : i32
    %c0_i32_2 = arith.constant 0 : i32
    return %c0_i32, %c0_i32_0, %c0_i32_1 : i32, i32, i32
  }
  func.func @transform_15(%arg0: i32) -> (i32, i32, i32) {
    %c0_i32 = arith.constant 0 : i32
    %c0_i32_0 = arith.constant 0 : i32
    %c0_i32_1 = arith.constant 0 : i32
    %c0_i32_2 = arith.constant 0 : i32
    return %c0_i32, %c0_i32_0, %c0_i32_1 : i32, i32, i32
  }
  func.func @transform_16(%arg0: i32) -> (i32, i32, i32) {
    %c0_i32 = arith.constant 0 : i32
    %c0_i32_0 = arith.constant 0 : i32
    %c0_i32_1 = arith.constant 0 : i32
    %c0_i32_2 = arith.constant 0 : i32
    return %c0_i32, %c0_i32_0, %c0_i32_1 : i32, i32, i32
  }
  func.func @transform_17(%arg0: i32) -> (i32, i32, i32) {
    %c0_i32 = arith.constant 0 : i32
    %c0_i32_0 = arith.constant 0 : i32
    %c0_i32_1 = arith.constant 0 : i32
    %c0_i32_2 = arith.constant 0 : i32
    return %c0_i32, %c0_i32_0, %c0_i32_1 : i32, i32, i32
  }
  func.func @transform_18(%arg0: i32) -> (i32, i32, i32) {
    %c0_i32 = arith.constant 0 : i32
    %c0_i32_0 = arith.constant 0 : i32
    %c0_i32_1 = arith.constant 0 : i32
    %c0_i32_2 = arith.constant 0 : i32
    return %c0_i32, %c0_i32_0, %c0_i32_1 : i32, i32, i32
  }
  func.func @transform_19(%arg0: i32) -> (i32, i32, i32) {
    %c0_i32 = arith.constant 0 : i32
    %c0_i32_0 = arith.constant 0 : i32
    %c0_i32_1 = arith.constant 0 : i32
    %c0_i32_2 = arith.constant 0 : i32
    return %c0_i32, %c0_i32_0, %c0_i32_1 : i32, i32, i32
  }
  func.func @transform_20(%arg0: i32) -> (i32, i32, i32) {
    %c0_i32 = arith.constant 0 : i32
    %c0_i32_0 = arith.constant 0 : i32
    %c0_i32_1 = arith.constant 0 : i32
    %c0_i32_2 = arith.constant 0 : i32
    return %c0_i32, %c0_i32_0, %c0_i32_1 : i32, i32, i32
  }
  func.func @transform_21(%arg0: i32) -> (i32, i32, i32) {
    %c0_i32 = arith.constant 0 : i32
    %c0_i32_0 = arith.constant 0 : i32
    %c0_i32_1 = arith.constant 0 : i32
    %c0_i32_2 = arith.constant 0 : i32
    return %c0_i32, %c0_i32_0, %c0_i32_1 : i32, i32, i32
  }
  func.func @transform_22(%arg0: i32) -> (i32, i32) {
    %c0_i32 = arith.constant 0 : i32
    %c0_i32_0 = arith.constant 0 : i32
    %c0_i32_1 = arith.constant 0 : i32
    return %c0_i32, %c0_i32_0 : i32, i32
  }
  func.func @transform_23(%arg0: i32) -> (i32, i32) {
    %c0_i32 = arith.constant 0 : i32
    %c0_i32_0 = arith.constant 0 : i32
    %c0_i32_1 = arith.constant 0 : i32
    return %c0_i32, %c0_i32_0 : i32, i32
  }
  func.func @transform_24(%arg0: i32) -> (i32, i32, i32) {
    %c0_i32 = arith.constant 0 : i32
    %c0_i32_0 = arith.constant 0 : i32
    %c0_i32_1 = arith.constant 0 : i32
    return %arg0, %c0_i32, %c0_i32_0 : i32, i32, i32
  }
}

</mosaic_0001>

<bundles_post_ra>
// kernel: transformer_policy_forward.1
= control target key start
LH: loop header
LB: loop body
LE: loop exit
PB: predicated region body
PF: predicated region fallthrough
CT: control target
= control target key end

     0   :  { %s4598_s0 = inlined_call_operand.vmem [shape: f32[2,8,16], index: 0, kind: input, shape index: {}]   ;;  %s4599_s1 = inlined_call_operand.vmem [shape: f32[32,32], index: 1, kind: input, shape index: {}]   ;;  %s4600_s2 = inlined_call_operand.vmem [shape: f32[32,4], index: 2, kind: input, shape index: {}]   ;;  %s4601_s3 = inlined_call_operand.vmem [shape: f32[4,32], index: 3, kind: input, shape index: {}]   ;;  %s4602_s4 = inlined_call_operand.vmem [shape: f32[16,32], index: 4, kind: input, shape index: {}]   ;;  %s4603_s5 = inlined_call_operand.hbm [shape: f32[1,32], index: 5, kind: input, shape index: {}]   ;;  %s4604_s6 = inlined_call_operand.vmem [shape: f32[2,32,32], index: 6, kind: input, shape index: {}]   ;;  %s4605_s7 = inlined_call_operand.vmem [shape: f32[2,1,32], index: 7, kind: input, shape index: {}]   ;;  %s4606_s8 = inlined_call_operand.vmem [shape: f32[2,32,32], index: 8, kind: input, shape index: {}]   ;;  %s4607_s9 = inlined_call_operand.hbm [shape: f32[2,1,32], index: 9, kind: input, shape index: {}]   ;;  %s4608_s10 = inlined_call_operand.vmem [shape: f32[2,32,32], index: 10, kind: input, shape index: {}]   ;;  %s4609_s11 = inlined_call_operand.hbm [shape: f32[2,1,32], index: 11, kind: input, shape index: {}]   ;;  %s4610_s12 = inlined_call_operand.vmem [shape: f32[2,32,32], index: 12, kind: input, shape index: {}]   ;;  %s4611_s13 = inlined_call_operand.hbm [shape: f32[2,1,32], index: 13, kind: input, shape index: {}]   ;;  %s4612_s14 = inlined_call_operand.vmem [shape: f32[2,1,32], index: 14, kind: input, shape index: {}]   ;;  %s4613_s15 = inlined_call_operand.vmem [shape: f32[2,1,32], index: 15, kind: input, shape index: {}]   ;;  %s4614_s16 = inlined_call_operand.vmem [shape: f32[2,32,64], index: 16, kind: input, shape index: {}]   ;;  %s4615_s17 = inlined_call_operand.hbm [shape: f32[2,1,64], index: 17, kind: input, shape index: {}]   ;;  %s4616_s18 = inlined_call_operand.vmem [shape: f32[2,64,32], index: 18, kind: input, shape index: {}]   ;;  %s4617_s19 = inlined_call_operand.hbm [shape: f32[2,1,32], index: 19, kind: input, shape index: {}]   ;;  %s4618_s20 = inlined_call_operand.vmem [shape: f32[2,1,32], index: 20, kind: input, shape index: {}]   ;;  %s4619_s21 = inlined_call_operand.vmem [shape: f32[2,1,32], index: 21, kind: input, shape index: {}]   ;;  %s4620_s22 = inlined_call_operand.vmem [shape: f32[32,8], index: 22, kind: input, shape index: {}]   ;;  %s4621_s23 = inlined_call_operand.hbm [shape: f32[1,8], index: 23, kind: input, shape index: {}]   ;;  %s4622_s24 = inlined_call_operand.hbm [shape: f32[2,1,8], index: 24, kind: output, shape index: {}]  }
   0x1   :  { %4643 = sst [smem:[#allocation26_spill]] %s4598_s0 }
   0x2   :  { %4644 = sst [smem:[#allocation27_spill]] %s4599_s1 }
   0x3   :  { %4645 = sst [smem:[#allocation28_spill]] %s4600_s2 }
   0x4   :  { %4646 = sst [smem:[#allocation29_spill]] %s4601_s3 }
   0x5   :  { %4647 = sst [smem:[#allocation30_spill]] %s4602_s4 }
   0x6   :  { %4648 = sst [smem:[#allocation31_spill]] %s4603_s5 }
   0x7   :  { %4649 = sst [smem:[#allocation32_spill]] %s4604_s6 }
   0x8   :  { %4650 = sst [smem:[#allocation33_spill]] %s4605_s7 }
   0x9   :  { %4651 = sst [smem:[#allocation34_spill]] %s4606_s8 }
   0xa   :  { %4652 = sst [smem:[#allocation35_spill]] %s4607_s9 }
   0xb   :  { %4653 = sst [smem:[#allocation36_spill]] %s4609_s11 }
   0xc   :  { %4654 = sst [smem:[#allocation37_spill]] %s4622_s24 }
   0xd   :  { %29 = vsyncpa [#allocation3], 0 }
   0xe   :  { %30 = vsyncpa [#allocation6], 0 }
   0xf   :  { %31 = vsyncpa [#allocation9], 0 }
  0x10   :  { %32 = vsyncpa [#allocation12], 0 }
  0x11   :  { %33 = vsyncpa [#allocation4], 0 }
  0x12   :  { %35 = vsyncpa [#allocation4 + $0x1], 0  ;;  %s3935_s5 = smov 0   ;;  %s3937_s26 = smov 0  }
  0x13   :  { %s3939_s27 = smov 0   ;;  %s3941_s28 = smov 0  }
  0x14 LB: > { %4655 = sst [smem:[#allocation20_spill]] %s3784_s5  ;;  %s3956_s6 = sadd.s32 4294967295, %s3796_s28   ;;  %s3796_s28 = sphi %s3941_s28, %s4693_s28   ;;  %s3792_s27 = sphi %s3939_s27, %s4695_s27   ;;  %s3788_s26 = sphi %s3937_s26, %s4697_s26   ;;  %s3784_s5 = sphi %s3935_s5, %s4696_s5  }
  0x15   : > { %4656 = sst [smem:[#allocation21_spill]] %s3792_s27  ;;  %s2944_s2 = sadd.s32 4294967294, %s3796_s28  }
  0x16   : > { %4657 = sst [smem:[#allocation22_spill]] %s3796_s28  ;;  %s3960_s29 = sadd.s32 1, %s3796_s28  }
  0x17   : > { %4658 = sst [smem:[#allocation23_spill]] %s3960_s29  ;;  %s557_s0 = sadd.s32 1, %s3792_s27 }
  0x18   : > { %s554_s7 = ssub.s32 %s3796_s28, %s3960_s29  ;;  %p567_p0 = scmp.ne.s32.totalorder %s3792_s27, %s3788_s26 }
  0x19   : > { %p555_p1 = scmp.eq.s32.totalorder %s554_s7, 0  ;;  %p568_p2 = scmp.eq.s32.totalorder %s3956_s6, 1 }
  0x1a   : > { %p573_p3 = scmp.ne.s32.totalorder %s3788_s26, %s3784_s5  ;;  %p574_p4 = scmp.eq.s32.totalorder %s2944_s2, 1 }
  0x1b   : > { %s3971_s30 = scalar_select %p555_p1, %s3792_s27, %s557_s0  }
  0x1c   : > { %p3973_p5 = por %p568_p2, %p567_p0  ;;  %p3977_p6 = por %p574_p4, %p573_p3 }
  0x1d   : > { %4659 = sst [smem:[#allocation24_spill]] %s3971_s30  ;;  %p2945_p7 = scmp.ge.s32.totalorder %s3796_s28, 1 }
  0x1e   : > { %s4660_s3 = scalar_select %p3973_p5, 1, 0 }
  0x1f   : > { %s4661_s25 = scalar_select %p3977_p6, 1, 0 }
  0x20   : > { %p581_p8 = scmp.lt.s32.totalorder %s3796_s28, 3  ;;  %p4636_p9 = scmp.eq.s32.totalorder %s3956_s6, 0 }
  0x21   : > { %4662 = sst [smem:[#allocation25_spill]] %s4661_s25  ;;  %s3798_s4 = smov [#allocation5]  }
  0x22   : > { %p3984_p10 = pnand %p2945_p7, %p581_p8  ;;  %s625_s1 = sshll.u32 %s3798_s4, 4  ;;  %s626_s1 = int_to_ptr.vmem [resolvable:$true] %s625_s1 }
  0x23   : > { %s3799_s0 = smov [#allocation8]   ;;  %s3800_s30 = smov [#allocation11]  }
  0x24   : > { %s4663_s8 = scalar_select %p3984_p10, 1, 0 }
  0x25   : > { %p3434_p11 = pneg %p3984_p10  ;;  %s657_s7 = sshll.u32 %s3799_s0, 4  ;;  %s658_s7 = int_to_ptr.vmem [resolvable:$true] %s657_s7 }
  0x26   : > { %s695_s27 = sshll.u32 %s3800_s30, 4  ;;  %s3549_s4 = scalar_lea.vmem %s626_s1, 32  ;;  %s696_s27 = int_to_ptr.vmem [resolvable:$true] %s695_s27 }
  0x27   : > { %p3992_p12 = pnand %p4636_p9, %p3434_p11  ;;  %p3550_p0 = scmp.ne.s32.totalorder %s626_s1, %s3549_s4 }
  0x28   : > { %p3557_p3 = scmp.lt.s32.totalorder %s626_s1, %s626_s1  ;;  %p3558_p4 = scmp.lt.s32.totalorder %s3549_s4, %s3549_s4 }
  0x29   : > { %p3998_p13 = pneg %p3992_p12 }
  0x2a   : > { %p3559_p7 = por %p3558_p4, %p3557_p3 }
  0x2b   : > { %p3552_p1 = pnand %p3550_p0, %p3998_p13 }
  0x2d   : > { %p3553_p2 = pneg %p3552_p1 }
  0x2f   : > { %p3560_p8 = pnand %p3559_p7, %p3553_p2 }
  0x31   : > { %3563 = shalt.err (!%p3560_p8)
}
  0x32   : > { %s3801_s0 = smov 16   ;;  %s3802_s30 = smov 1  }
  0x33   : > { %s4666_s9 = sld [smem:[#allocation35_spill]]  ;;  %s3575_s28 = scalar_lea.vmem %s658_s7, 32 }
  0x34   : > { %p3576_p11 = scmp.ne.s32.totalorder %s658_s7, %s3575_s28  ;;  %p3583_p3 = scmp.lt.s32.totalorder %s658_s7, %s658_s7 }
  0x35   : > { %p3584_p2 = scmp.lt.s32.totalorder %s3575_s28, %s3575_s28 }
  0x36   : > { %p3578_p0 = pnand %p3576_p11, %p3998_p13 }
  0x37   : > { %p3585_p4 = por %p3584_p2, %p3583_p3 }
  0x38   : > { %p3579_p1 = pneg %p3578_p0 }
  0x39   : > { %3440 = dma.hbm_to_vmem [thread:$0]  (!%p3992_p12), %s4666_s9, 32, %s626_s1, [#allocation6], %s3801_s0, %s3801_s0, %s3802_s30  }
  0x3a   : > { %p3586_p7 = pnand %p3585_p4, %p3579_p1 }
  0x3c   : > { %3589 = shalt.err (!%p3586_p7)
}
  0x3d   : > { %3446 = dma.hbm_to_vmem [thread:$0]  (!%p3992_p12), %s4611_s13, 32, %s658_s7, [#allocation9], %s3801_s0, %s3801_s0, %s3802_s30  }
  0x3e   : > { %s3601_s5 = scalar_lea.vmem %s696_s27, 32  ;;  %p3609_p9 = scmp.lt.s32.totalorder %s696_s27, %s696_s27 }
  0x3f   : > { %p3602_p8 = scmp.ne.s32.totalorder %s696_s27, %s3601_s5  ;;  %p3610_p3 = scmp.lt.s32.totalorder %s3601_s5, %s3601_s5 }
  0x41   : > { %p3604_p11 = pnand %p3602_p8, %p3998_p13  ;;  %p3611_p1 = por %p3610_p3, %p3609_p9 }
  0x43   : > { %p3605_p0 = pneg %p3604_p11 }
  0x45   : > { %p3612_p2 = pnand %p3611_p1, %p3605_p0 }
  0x47   : > { %3615 = shalt.err (!%p3612_p2)
}
  0x48   : > { %3452 = dma.hbm_to_vmem [thread:$0]  (!%p3992_p12), %s4617_s19, 32, %s696_s27, [#allocation12], %s3801_s0, %s3801_s0, %s3802_s30  }
  0x49   : > { %s3803_s25 = smov [#allocation2]   ;;  %s3804_s7 = smov [#allocation7]  }
  0x4a   : > { %s606_s1 = sshll.u32 %s3803_s25, 4  ;;  %s641_s4 = sshll.u32 %s3804_s7, 4  ;;  %s607_s1 = int_to_ptr.vmem [resolvable:$true] %s606_s1  ;;  %s642_s4 = int_to_ptr.vmem [resolvable:$true] %s641_s4 }
  0x4b   : > { %s3627_s9 = scalar_lea.vmem %s607_s1, 16  ;;  %s3634_s5 = scalar_lea.vmem %s607_s1, 32 }
  0x4c   : > { %p3628_p4 = scmp.ne.s32.totalorder %s607_s1, %s3627_s9  ;;  %p3635_p8 = scmp.lt.s32.totalorder %s607_s1, %s607_s1 }
  0x4d   : > { %p3636_p11 = scmp.lt.s32.totalorder %s3634_s5, %s3627_s9 }
  0x4e   : > { %p3630_p9 = pnand %p3628_p4, %p3998_p13 }
  0x4f   : > { %p3637_p0 = por %p3636_p11, %p3635_p8 }
  0x50   : > { %p3631_p7 = pneg %p3630_p9 }
  0x52   : > { %p3638_p3 = pnand %p3637_p0, %p3631_p7 }
  0x54   : > { %3641 = shalt.err (!%p3638_p3)
}
  0x55   : > { %s4667_s24 = sld [smem:[#allocation31_spill]]  ;;  %s3653_s25 = scalar_lea.vmem %s642_s4, 32 }
  0x56   : > { %p3654_p1 = scmp.ne.s32.totalorder %s642_s4, %s3653_s25  ;;  %p3661_p9 = scmp.lt.s32.totalorder %s642_s4, %s642_s4 }
  0x57   : > { %p3662_p6 = scmp.lt.s32.totalorder %s3653_s25, %s3653_s25 }
  0x58   : > { %p3656_p2 = pnand %p3654_p1, %p3998_p13 }
  0x59   : > { %p3663_p5 = por %p3662_p6, %p3661_p9 }
  0x5a   : > { %p3657_p4 = pneg %p3656_p2 }
  0x5b   : > { %3437 = dma.hbm_to_vmem [thread:$0]  (!%p3992_p12), %s4667_s24, 16, %s607_s1, [#allocation3]  }
  0x5c   : > { %p3664_p10 = pnand %p3663_p5, %p3657_p4 }
  0x5e   : > { %3667 = shalt.err (!%p3664_p10)
}
  0x5f   : > { %s4668_s11 = sld [smem:[#allocation36_spill]]  ;;  %s3805_s1 = smov [#allocation10]  }
  0x60   : > { %s679_s5 = sshll.u32 %s3805_s1, 4  ;;  %s3806_s28 = smov [#allocation13]   ;;  %s680_s5 = int_to_ptr.vmem [resolvable:$true] %s679_s5 }
  0x61   : > { %s718_s27 = sshll.u32 %s3806_s28, 4  ;;  %s3679_s24 = scalar_lea.vmem %s680_s5, 32  ;;  %s719_s27 = int_to_ptr.vmem [resolvable:$true] %s718_s27 }
  0x62   : > { %p3680_p7 = scmp.ne.s32.totalorder %s680_s5, %s3679_s24  ;;  %p3687_p10 = scmp.lt.s32.totalorder %s680_s5, %s680_s5 }
  0x63   : > { %p3688_p8 = scmp.lt.s32.totalorder %s3679_s24, %s3679_s24 }
  0x64   : > { %p3682_p5 = pnand %p3680_p7, %p3998_p13 }
  0x65   : > { %3443 = dma.hbm_to_vmem [thread:$0]  (!%p3992_p12), %s4668_s11, 32, %s642_s4, [#allocation6], %s3801_s0, %s3801_s0, %s3802_s30  }
  0x66   : > { %p3683_p6 = pneg %p3682_p5  ;;  %p3689_p11 = por %p3688_p8, %p3687_p10 }
  0x68   : > { %p3690_p0 = pnand %p3689_p11, %p3683_p6 }
  0x6a   : > { %3693 = shalt.err (!%p3690_p0)
}
  0x6b   : > { %3449 = dma.hbm_to_vmem [thread:$0]  (!%p3992_p12), %s4615_s17, 32, %s680_s5, [#allocation9], %s3801_s0, %s3801_s0, %s3802_s30  }
  0x6c   : > { %s3705_s9 = scalar_lea.vmem %s719_s27, 16  ;;  %s3712_s7 = scalar_lea.vmem %s719_s27, 32 }
  0x6d   : > { %p3706_p3 = scmp.ne.s32.totalorder %s719_s27, %s3705_s9  ;;  %p3713_p4 = scmp.lt.s32.totalorder %s719_s27, %s719_s27 }
  0x6e   : > { %p3714_p9 = scmp.lt.s32.totalorder %s3712_s7, %s3705_s9 }
  0x6f   : > { %p3708_p1 = pnand %p3706_p3, %p3998_p13 }
  0x70   : > { %p3715_p7 = por %p3714_p9, %p3713_p4 }
  0x71   : > { %p3709_p2 = pneg %p3708_p1 }
  0x73   : > { %p3716_p5 = pnand %p3715_p7, %p3709_p2 }
  0x75   : > { %3719 = shalt.err (!%p3716_p5)
}
  0x76   : > { %3455 = dma.hbm_to_vmem [thread:$0]  (!%p3992_p12), %s4621_s23, 16, %s719_s27, [#allocation12]  }
  0x77   : > { %p4669_p6 = scmp.ne.s32.totalorder %s4663_s8, 0 }
  0x78   : > { %p4670_p10 = scmp.eq.s32.totalorder (!%p4669_p6), %s3956_s6, 0 }
  0x79   : > { %738 = sbr.rel (%p4669_p6) target bundleno = 5604 (0x15e4), region = 116 }
  0x7e   : > { %3763 = dma.done.wait (%p4670_p10), [#allocation3], 16   ;;  %p4671_p13 = pmov %p4670_p10 }
  0x7f   : > { %p4672_p8 = pmov %p4670_p10 }
  0x80   : > { %3765 = vsyncadd (%p4671_p13), [#allocation3], 4294967280 }
  0x81   : > { %3767 = dma.done.wait (%p4672_p8), [#allocation6], 64   ;;  %p4673_p11 = pmov %p4672_p8 }
  0x82   : > { %p4674_p0 = pmov %p4672_p8 }
  0x83   : > { %3769 = vsyncadd (%p4673_p11), [#allocation6], 4294967232 }
  0x84   : > { %3771 = dma.done.wait (%p4674_p0), [#allocation9], 64   ;;  %p4675_p12 = pmov %p4674_p0 }
  0x85   : > { %p4676_p3 = pmov %p4674_p0 }
  0x86   : > { %3773 = vsyncadd (%p4675_p12), [#allocation9], 4294967232 }
  0x87   : > { %3775 = dma.done.wait (%p4676_p3), [#allocation12], 48   ;;  %p4677_p1 = pmov %p4674_p0 }
  0x88   : > { %p826_p2 = scmp.lt.s32.totalorder %s3956_s6, 1  ;;  %v3807_v0 = vmov 0.0   ;;  %vm3808_vm0 = vmmov 0   ;;  %s4678_s30 = sld [smem:[#allocation26_spill]]  ;;  %vm840_vm1 = vcmask 130048   ;;  %vm934_vm2 = vcmask 261120  }
  0x89   : > { %3777 = vsyncadd (%p4677_p1), [#allocation12], 4294967248  ;;  %3162 = vmatprep.subr.mxu0 %v3807_v0  ;;  %3166 = vmatprep.mubr.msk.f32.mxu0 %vm3808_vm0, %v3807_v0  ;;  %s4679_s4 = sld [smem:[#allocation30_spill]]  ;;  %v2963_v12 = vld [vmem:[#allocation2] ss:$0 sm:$0xff]  ;;  %v1092_v15 = vld [vmem:[%s4608_s10 + $0x18] sm:$0xff] }
  0x8a   : > { %s827_s29 = scalar_select %p826_p2, %s3956_s6, 1  ;;  %3169 = vmatprep.subr.mxu1 %v3807_v0  ;;  %3177 = vmatprep.mubr.msk.f32.mxu1 %vm3808_vm0, %v3807_v0  ;;  %v1091_v17 = vld [vmem:[%s4608_s10 + $0x10] sm:$0xff]  ;;  %v1090_v18 = vld [vmem:[%s4608_s10 + $0x8] sm:$0xff]  ;;  %v1089_v19 = vld [vmem:[%s4608_s10] sm:$0xff]  ;;  %vm1348_vm3 = vcmask 1043456   ;;  %vm1344_vm4 = vcmask 31744  }
  0x8b   : > { %s4680_s28 = sld [smem:[#allocation32_spill]]  ;;  %v2967_v20 = vld [vmem:[#allocation5] ss:$0 sm:$0xff]  ;;  %v2969_v35 = vld [vmem:[#allocation7] ss:$0 sm:$0xff]  ;;  %v1499_v60 = vld [vmem:[%s4610_s12 + $0x18] sm:$0xff] }
  0x8c   : > { %s2962_s8 = sshll.u32 %s827_s29, 3  ;;  %s4682_s2 = sld [smem:[#allocation34_spill]]  ;;  %v1498_v61 = vld [vmem:[%s4610_s12 + $0x10] sm:$0xff]  ;;  %v1497_v62 = vld [vmem:[%s4610_s12 + $0x8] sm:$0xff]  ;;  %vm1711_vm5 = vcmask 523264   ;;  %vm2794_vm6 = vcmask 57344  }
  0x8d   : > { %s4683_s29 = sld [smem:[#allocation27_spill]]  ;;  %s824_s1 = sand.u32 1, %s3788_s26  }
  0x8e   : > { %s829_s5 = scalar_lea.vmem %s4678_s30, %s2962_s8  ;;  %s4684_s7 = sld [smem:[#allocation33_spill]] }
  0x8f   : > { %v832_v1 = vld [vmem:[%s4679_s4 + $0x8] sm:$0xff]  ;;  %v831_v2 = vld [vmem:[%s4679_s4] sm:$0xff]  ;;  %s4685_s8 = sld [smem:[#allocation28_spill]]  ;;  %s825_s0 = scalar_lea.vmem [#allocation14], %s824_s1 }
  0x90   : > { %3163 = vmatpush3.msra.mxu0 %v832_v1  ;;  %v830_v3 = vld [vmem:[%s829_s5] sm:$0xff]  ;;  %s2820_s30 = sshll.u32 %s825_s0, 4  ;;  %s4687_s24 = sld [smem:[#allocation37_spill]]  ;;  %s2821_s30 = int_to_ptr.vmem [resolvable:$true] %s2820_s30 }
  0x91   : > { %s4681_s11 = smov %s4680_s28  ;;  %v926_v4 = vld [vmem:[%s4680_s28 + $0x18] sm:$0xff]  ;;  %3164 = vmatprep.subr.mxu0 %v3807_v0  ;;  %s4686_s28 = sld [smem:[#allocation29_spill]] }
  0x92   : > { %3170 = vmatpush3.msra.mxu1 %v926_v4  ;;  %v1011_v5 = vld [vmem:[%s4682_s2 + $0x18] sm:$0xff]  ;;  %v925_v6 = vld [vmem:[%s4681_s11 + $0x10] sm:$0xff]  ;;  %3165 = vmatpush3.msra.mxu0 %v831_v2  ;;  %v924_v8 = vld [vmem:[%s4681_s11 + $0x8] sm:$0xff]  ;;  %s2808_s25 = scalar_lea.sflag [#allocation4], %s824_s1  ;;  %s3720_s9 = scalar_lea.vmem %s2821_s30, 16 }
  0x93   : > { %3171 = vmatprep.subr.mxu1 %v3807_v0  ;;  %3167 = vmatmul.mubr.msk.f32.vlgmr.msra.gmra.mxu0 %vm840_vm1, %v830_v3  ;;  %v1010_v7 = vld [vmem:[%s4682_s2 + $0x10] sm:$0xff]  ;;  %v1009_v9 = vld [vmem:[%s4682_s2 + $0x8] sm:$0xff]  ;;  %v923_v10 = vld [vmem:[%s4681_s11] sm:$0xff]  ;;  %p3721_p4 = scmp.ne.s32.totalorder %s2821_s30, %s3720_s9  ;;  %p4688_p9 = scmp.ne.s32.totalorder %s4660_s3, 0 }
  0x94   : > { %3180 = vmatprep.subr.mxu0 %v3807_v0  ;;  %3172 = vmatpush3.msra.mxu1 %v925_v6  ;;  %v1008_v11 = vld [vmem:[%s4682_s2] sm:$0xff]  ;;  %v4170_v22 = vld [vmem:[%s4683_s29 + $0x18] sm:$0xff]  ;;  %v4176_v28 = vld [vmem:[%s4683_s29 + $0x10] sm:$0xff] }
  0x95   : > { %3181 = vmatpush3.msra.mxu0 %v1011_v5  ;;  %3173 = vmatprep.subr.mxu1 %v3807_v0  ;;  %v4184_v30 = vld [vmem:[%s4683_s29 + $0x8] sm:$0xff]  ;;  %v4192_v34 = vld [vmem:[%s4683_s29] sm:$0xff]  ;;  %v4217_v48 = vld [vmem:[%s4685_s8 + $0x18] sm:$0xff]  ;;  %p3722_p7 = pnand %p3721_p4, %p4688_p9 }
  0x96   : > { %3182 = vmatprep.subr.mxu0 %v3807_v0  ;;  %3174 = vmatpush3.msra.mxu1 %v924_v8  ;;  %v2965_v36 = vld [vmem:[%s4684_s7] ss:$0 sm:$0xff]  ;;  %v4222_v49 = vld [vmem:[%s4685_s8 + $0x10] sm:$0xff]  ;;  %v4229_v50 = vld [vmem:[%s4685_s8 + $0x8] sm:$0xff] }
  0x97   : > { %3183 = vmatpush3.msra.mxu0 %v1010_v7  ;;  %3175 = vmatprep.subr.mxu1 %v3807_v0  ;;  %v4236_v51 = vld [vmem:[%s4685_s8] sm:$0xff]  ;;  %p3723_p5 = pneg %p3722_p7 }
  0x98   : > { %3184 = vmatprep.subr.mxu0 %v3807_v0  ;;  %3188 = vmatprep.mubr.msk.f32.mxu0 %vm3808_vm0, %v3807_v0  ;;  %v4248_v56 = vld [vmem:[%s4686_s28] sm:$0xf]  ;;  %v2980_v6 = vld [vmem:[#allocation8] ss:$0 sm:$0xff]  ;;  %s3049_s28 = sshll.u32 %s3956_s6, 4 }
  0x99   : > { %3185 = vmatpush3.msra.mxu0 %v1009_v9  ;;  %3176 = vmatpush3.msra.mxu1 %v923_v10  ;;  %v1496_v3 = vld [vmem:[%s4610_s12] sm:$0xff]  ;;  %s2818_s4 = scalar_lea.hbm %s4687_s24, %s3049_s28 }
  0x9a   : > { %3186 = vmatprep.subr.mxu0 %v3807_v0  ;;  %3191 = vmatprep.subr.mxu1 %v3807_v0 }
  0x9b   : > { %3187 = vmatpush3.msra.mxu0 %v1008_v11 }
  0x9c   : > { %3202 = vmatprep.subr.mxu0 %v3807_v0 }
 0x153   : > { %v910_v13 = vpop.f32.mrf.mxu0 }
 0x154   : > { %v4137_v14 = vadd.f32 %v2963_v12, %v910_v13 }
 0x155   : > { %v3168_v16 = vpop.f32.mrf.mxu0 }
 0x156   : > { %3178 = vmatmul.mubr.msk.f32.vlgmr.msra.gmra.mxu1 %vm934_vm2, %v4137_v14  ;;  %3189 = vmatmul.mubr.msk.f32.vlgmr.msra.gmra.mxu0 %vm934_vm2, %v4137_v14 }
 0x157   : > { %3192 = vmatpush3.msra.mxu1 %v1092_v15  ;;  %3199 = vmatprep.mubr.msk.f32.mxu1 %vm3808_vm0, %v3807_v0 }
 0x158   : > { %3193 = vmatprep.subr.mxu1 %v3807_v0  ;;  %3210 = vmatprep.mubr.msk.f32.mxu0 %vm3808_vm0, %v3807_v0 }
 0x159   : > { %3194 = vmatpush3.msra.mxu1 %v1091_v17 }
 0x15a   : > { %3195 = vmatprep.subr.mxu1 %v3807_v0 }
 0x15b   : > { %3196 = vmatpush3.msra.mxu1 %v1090_v18  ;;  %v1614_v18 = vld [vmem:[%s4614_s16 + $0x18] sm:$0xff] }
 0x15c   : > { %3197 = vmatprep.subr.mxu1 %v3807_v0 }
 0x15d   : > { %3198 = vmatpush3.msra.mxu1 %v1089_v19  ;;  %v1613_v19 = vld [vmem:[%s4614_s16 + $0x10] sm:$0xff] }
 0x15e   : > { %3200 = vmatmul.mubr.msk.f32.vlgmr.msra.gmra.mxu1 %vm934_vm2, %v4137_v14  ;;  %3213 = vmatprep.subr.mxu1 %v3807_v0 }
 0x15f   : > { %3221 = vmatprep.mubr.msk.f32.mxu1 %vm3808_vm0, %v3807_v0  ;;  %3214 = vmatpush3.msra.mxu1 %v4217_v48 }
 0x160   : > { %3215 = vmatprep.subr.mxu1 %v3807_v0 }
 0x161   : > { %3216 = vmatpush3.msra.mxu1 %v4222_v49 }
 0x162   : > { %3217 = vmatprep.subr.mxu1 %v3807_v0 }
 0x163   : > { %3218 = vmatpush3.msra.mxu1 %v4229_v50 }
 0x164   : > { %3219 = vmatprep.subr.mxu1 %v3807_v0 }
 0x165   : > { %3220 = vmatpush3.msra.mxu1 %v4236_v51 }
 0x166   : > { %3224 = vmatprep.subr.mxu1 %v3807_v0 }
 0x216   : > { %v1004_v21 = vpop.f32.mrf.mxu1  ;;  %v1085_v23 = vpop.f32.mrf.mxu0 }
 0x217   : > { %v1086_v24 = vadd.f32 %v2967_v20, %v1085_v23  ;;  %v1005_v39 = vadd.f32 %v2965_v36, %v1004_v21  ;;  %v1611_v20 = vld [vmem:[%s4614_s16] sm:$0xff]  ;;  %v1703_v21 = vld [vmem:[%s4616_s18 + $0x38] sm:$0xff]  ;;  %v1702_v23 = vld [vmem:[%s4616_s18 + $0x30] sm:$0xff] }
 0x218   : > { %v3179_v25 = vpop.f32.mrf.mxu1  ;;  %v3190_v26 = vpop.f32.mrf.mxu0  ;;  %v2983_v36 = vld [vmem:[%s4613_s15] ss:$0 sm:$0xff] }
 0x219   : > { %v1173_v27 = vmul.f32 %v1086_v24, %v4170_v22  ;;  %v1172_v29 = vmul.f32 %v1086_v24, %v4176_v28  ;;  %v1171_v33 = vmul.f32 %v1086_v24, %v4184_v30  ;;  %v1170_v37 = vmul.f32 %v1086_v24, %v4192_v34  ;;  %v1701_v24 = vld [vmem:[%s4616_s18 + $0x28] sm:$0xff]  ;;  %v1700_v25 = vld [vmem:[%s4616_s18 + $0x20] sm:$0xff]  ;;  %v1699_v26 = vld [vmem:[%s4616_s18 + $0x18] sm:$0xff] }
 0x21b   : > { %3203 = vmatpush3.xpose.msk.msra.mxu0 %vm934_vm2, %v1173_v27 }
 0x21c   : > { %3204 = vmatprep.subr.mxu0 %v3807_v0 }
 0x21e   : > { %v1166_v31 = vpop.f32.mrf.mxu1 }
 0x21f   : > { %3205 = vmatpush3.xpose.msk.msra.mxu0 %vm934_vm2, %v1172_v29  ;;  %v1167_v38 = vadd.f32 %v2969_v35, %v1166_v31 }
 0x220   : > { %v3201_v32 = vpop.f32.mrf.mxu1  ;;  %3206 = vmatprep.subr.mxu0 %v3807_v0 }
 0x221   : > { %v1177_v40 = vmul.f32 %v1167_v38, %v4170_v22  ;;  %v1176_v41 = vmul.f32 %v1167_v38, %v4176_v28  ;;  %v1175_v42 = vmul.f32 %v1167_v38, %v4184_v30  ;;  %v1174_v43 = vmul.f32 %v1167_v38, %v4192_v34 }
 0x223   : > { %3207 = vmatpush3.xpose.msk.msra.mxu0 %vm934_vm2, %v1171_v33  ;;  %v2982_v33 = vld [vmem:[%s4612_s14] ss:$0 sm:$0xff] }
 0x224   : > { %3208 = vmatprep.subr.mxu0 %v3807_v0 }
 0x227   : > { %3209 = vmatpush3.xpose.msk.msra.mxu0 %vm934_vm2, %v1170_v37 }
 0x228   : > { %3229 = vmatprep.subr.mxu0 %v3807_v0 }
 0x22a   : > { %3211 = vmatmul.mubr.msk.f32.vlgmr.msra.gmra.mxu0 %vm934_vm2, %v1005_v39  ;;  %v1698_v39 = vld [vmem:[%s4616_s18 + $0x10] sm:$0xff] }
 0x22b   : > { %3230 = vmatpush3.msra.mxu0 %v1177_v40  ;;  %3237 = vmatprep.mubr.msk.f32.mxu0 %vm3808_vm0, %v3807_v0  ;;  %v1697_v40 = vld [vmem:[%s4616_s18 + $0x8] sm:$0xff] }
 0x22c   : > { %3231 = vmatprep.subr.mxu0 %v3807_v0 }
 0x22d   : > { %3232 = vmatpush3.msra.mxu0 %v1176_v41  ;;  %v1696_v41 = vld [vmem:[%s4616_s18] sm:$0xff] }
 0x22e   : > { %3233 = vmatprep.subr.mxu0 %v3807_v0 }
 0x22f   : > { %3234 = vmatpush3.msra.mxu0 %v1175_v42  ;;  %v2984_v42 = vld [vmem:[#allocation10] ss:$0 sm:$0xff] }
 0x230   : > { %3235 = vmatprep.subr.mxu0 %v3807_v0 }
 0x231   : > { %3236 = vmatpush3.msra.mxu0 %v1174_v43 }
 0x232   : > { %3251 = vmatprep.subr.mxu0 %v3807_v0 }
 0x2ea   : > { %v1259_v44 = vpop.f32.mrf.mxu0 }
 0x2eb   : > { %v1263_v45 = vmul.f32 0.35355338, %v1259_v44 }
 0x2ec   : > { %v3212_v46 = vpop.f32.mrf.mxu0 }
 0x2ed   : > { %v1264_v47 = vsel %vm934_vm2, %v1263_v45, -inf }
 0x2ee   : > { %1265 = vmax.xlane.f32.xlu0 %v1264_v47  ;;  %v2986_v47 = vld [vmem:[#allocation11] ss:$0 sm:$0xff] }
 0x377   : > { %v1266_v52 = vpop.xlane.xlu0 %1265 }
 0x378   : > { %v1267_v53 = vsub.f32 %v1263_v45, %v1266_v52 }
 0x37a   : > { %v1268_v54 = vmul.f32 1.442695, %v1267_v53 }
 0x37c   : > { %3518 = vpow2.f32 %v1268_v54 }
 0x389   : > { %v3519_v55 = vpop.eup %3518 }
 0x38a   : > { %3222 = vmatmul.mubr.msk.f32.vlgmr.msra.gmra.mxu1 %vm934_vm2, %v3519_v55 }
 0x38b   : > { %3226 = vmatprep.mubr.msk.f32.mxu1 %vm3808_vm0, %v3807_v0  ;;  %3225 = vmatpush3.msk.msra.mxu1 %vm1348_vm3, %v4248_v56 }
 0x38c   : > { %3240 = vmatprep.subr.mxu1 %v3807_v0 }
 0x44a   : > { %v1339_v57 = vpop.f32.mrf.mxu1 }
 0x44b   : > { %3520 = vrcp.f32 %v1339_v57 }
 0x44c   : > { %v3223_v58 = vpop.f32.mrf.mxu1 }
 0x458   : > { %v3521_v59 = vpop.eup %3520 }
 0x459   : > { %3227 = vmatmul.mubr.msk.f32.vlgmr.msra.gmra.mxu1 %vm1344_vm4, %v3521_v59 }
 0x45a   : > { %3248 = vmatprep.mubr.msk.f32.mxu1 %vm3808_vm0, %v3807_v0  ;;  %3241 = vmatpush3.msra.mxu1 %v1499_v60 }
 0x45b   : > { %3242 = vmatprep.subr.mxu1 %v3807_v0 }
 0x45c   : > { %3243 = vmatpush3.msra.mxu1 %v1498_v61 }
 0x45d   : > { %3244 = vmatprep.subr.mxu1 %v3807_v0 }
 0x45e   : > { %3245 = vmatpush3.msra.mxu1 %v1497_v62 }
 0x45f   : > { %3246 = vmatprep.subr.mxu1 %v3807_v0 }
 0x460   : > { %3247 = vmatpush3.msra.mxu1 %v1496_v3  ;;  %v3005_v3 = vld [vmem:[%s4608_s10 + $0x30] sm:$0xff] }
 0x461   : > { %3262 = vmatprep.subr.mxu1 %v3807_v0 }
 0x519   : > { %v1418_v63 = vpop.f32.mrf.mxu1 }
 0x51a   : > { %v1422_v1 = vmul.f32 %v3519_v55, %v1418_v63  ;;  %v2993_v63 = vld [vmem:[%s4681_s11 + $0x38] sm:$0xff] }
 0x51b   : > { %v3228_v2 = vpop.f32.mrf.mxu1 }
 0x51c   : > { %3238 = vmatmul.mubr.msk.f32.vlgmr.msra.gmra.mxu0 %vm934_vm2, %v1422_v1  ;;  %v3006_v1 = vld [vmem:[%s4608_s10 + $0x38] sm:$0xff]  ;;  %v2992_v2 = vld [vmem:[%s4681_s11 + $0x30] sm:$0xff] }
 0x51d   : > { %3259 = vmatprep.mubr.msk.f32.mxu0 %vm3808_vm0, %v3807_v0  ;;  %3252 = vmatpush3.msra.mxu0 %v1614_v18  ;;  %v3000_v18 = vld [vmem:[%s4682_s2 + $0x38] sm:$0xff] }
 0x51e   : > { %3253 = vmatprep.subr.mxu0 %v3807_v0 }
 0x51f   : > { %3254 = vmatpush3.msra.mxu0 %v1613_v19  ;;  %v2999_v19 = vld [vmem:[%s4682_s2 + $0x30] sm:$0xff] }
 0x520   : > { %3255 = vmatprep.subr.mxu0 %v3807_v0 }
 0x5dc   : > { %v1492_v4 = vpop.f32.mrf.mxu0 }
 0x5dd   : > { %3249 = vmatmul.mubr.msk.f32.vlgmr.msra.gmra.mxu1 %vm934_vm2, %v1492_v4  ;;  %v2991_v4 = vld [vmem:[%s4681_s11 + $0x28] sm:$0xff] }
 0x5de   : > { %v3239_v5 = vpop.f32.mrf.mxu0  ;;  %3278 = vmatprep.mubr.msk.f32.mxu1 %vm3808_vm0, %v3807_v0  ;;  %3263 = vmatpush3.msra.mxu1 %v1703_v21 }
 0x5df   : > { %3264 = vmatprep.subr.mxu1 %v3807_v0  ;;  %v3004_v5 = vld [vmem:[%s4608_s10 + $0x28] sm:$0xff] }
 0x5e0   : > { %3265 = vmatpush3.msra.mxu1 %v1702_v23  ;;  %v3001_v23 = vld [vmem:[#allocation5 + $0x1] ss:$0 sm:$0xff] }
 0x5e1   : > { %3266 = vmatprep.subr.mxu1 %v3807_v0 }
 0x5e2   : > { %3267 = vmatpush3.msra.mxu1 %v1701_v24 }
 0x5e3   : > { %3268 = vmatprep.subr.mxu1 %v3807_v0 }
 0x5e4   : > { %3269 = vmatpush3.msra.mxu1 %v1700_v25 }
 0x5e5   : > { %3270 = vmatprep.subr.mxu1 %v3807_v0 }
 0x5e6   : > { %3271 = vmatpush3.msra.mxu1 %v1699_v26 }
 0x5e7   : > { %3272 = vmatprep.subr.mxu1 %v3807_v0 }
 0x5e8   : > { %3273 = vmatpush3.msra.mxu1 %v1698_v39 }
 0x5e9   : > { %3274 = vmatprep.subr.mxu1 %v3807_v0 }
 0x5ea   : > { %3275 = vmatpush3.msra.mxu1 %v1697_v40 }
 0x5eb   : > { %3276 = vmatprep.subr.mxu1 %v3807_v0 }
 0x5ec   : > { %3277 = vmatpush3.msra.mxu1 %v1696_v41 }
 0x5ed   : > { %3303 = vmatprep.subr.mxu1 %v3807_v0 }
 0x69d   : > { %v1576_v7 = vpop.f32.mrf.mxu1 }
 0x69e   : > { %v1577_v8 = vadd.f32 %v2980_v6, %v1576_v7  ;;  %v2990_v6 = vld [vmem:[%s4681_s11 + $0x20] sm:$0xff] }
 0x69f   : > { %v3250_v9 = vpop.f32.mrf.mxu1  ;;  %v3003_v7 = vld [vmem:[%s4608_s10 + $0x20] sm:$0xff] }
 0x6a0   : > { %v1580_v10 = vadd.f32 %v1577_v8, %v4137_v14  ;;  %v1612_v14 = vld [vmem:[%s4614_s16 + $0x8] sm:$0xff] }
 0x6a1   : > { %3256 = vmatpush3.msra.mxu0 %v1612_v14  ;;  %v2998_v14 = vld [vmem:[%s4682_s2 + $0x28] sm:$0xff] }
 0x6a2   : > { %v1583_v11 = vsel %vm934_vm2, %v1580_v10, 0.0  ;;  %3257 = vmatprep.subr.mxu0 %v3807_v0 }
 0x6a3   : > { %1584 = vadd.xlane.f32.xlu0 %v1583_v11  ;;  %3258 = vmatpush3.msra.mxu0 %v1611_v20  ;;  %v2997_v20 = vld [vmem:[%s4682_s2 + $0x20] sm:$0xff]  ;;  %s3809_s2 = smov [#allocation14]  }
 0x6a4   : > { %3281 = vmatprep.subr.mxu0 %v3807_v0 }
 0x72c   : > { %v1585_v12 = vpop.xlane.xlu0 %1584 }
 0x72d   : > { %v1587_v13 = vmul.f32 0.03125, %v1585_v12  ;;  %v2988_v12 = vld [vmem:[%s4618_s20] ss:$0 sm:$0xff] }
 0x72f   : > { %v1588_v15 = vsub.f32 %v1580_v10, %v1587_v13 }
 0x731   : > { %v1589_v16 = vmul.f32 %v1588_v15, %v1588_v15 }
 0x733   : > { %v1590_v17 = vsel %vm934_vm2, %v1589_v16, 0.0 }
 0x734   : > { %1591 = vadd.xlane.f32.xlu1 %v1590_v17 }
 0x7bd   : > { %v1592_v27 = vpop.xlane.xlu1 %1591 }
 0x7be   : > { %v1593_v29 = vmul.f32 0.03125, %v1592_v27 }
 0x7c0   : > { %v1594_v31 = vadd.f32 1e-05, %v1593_v29 }
 0x7c2   : > { %3522 = vrsqrt.f32 %v1594_v31  ;;  %v2995_v31 = vld [vmem:[%s4684_s7 + $0x1] ss:$0 sm:$0xff]  ;;  %s3724_s7 = sshll.u32 %s3809_s2, 4  ;;  %s3725_s7 = int_to_ptr.vmem [resolvable:$false] %s3724_s7 }
 0x7c3   : > { %s3726_s6 = scalar_lea.vmem %s3725_s7, 32  ;;  %p3727_p6 = scmp.lt.s32.totalorder %s2821_s30, %s3725_s7 }
 0x7c4   : > { %p3728_p10 = scmp.lt.s32.totalorder %s3726_s6, %s3720_s9 }
 0x7c6   : > { %p3729_p13 = por %p3728_p10, %p3727_p6 }
 0x7c8   : > { %p3730_p8 = pnand %p3729_p13, %p3723_p5 }
 0x7cf   : > { %v3523_v32 = vpop.eup %3522 }
 0x7d0   : > { %v1596_v35 = vmul.f32 %v3523_v32, %v1588_v15  ;;  %v2989_v15 = vld [vmem:[%s4619_s21] ss:$0 sm:$0xff] }
 0x7d2   : > { %v1603_v37 = vmul.f32 %v2982_v33, %v1596_v35 }
 0x7d4   : > { %v1610_v38 = vadd.f32 %v2983_v36, %v1603_v37 }
 0x7d6   : > { %3260 = vmatmul.mubr.msk.f32.vlgmr.msra.gmra.mxu0 %vm934_vm2, %v1610_v38 }
 0x7d7   : > { %3289 = vmatprep.mubr.msk.f32.mxu0 %vm3808_vm0, %v3807_v0  ;;  %3282 = vmatpush3.msra.mxu0 %v2993_v63 }
 0x7d8   : > { %3283 = vmatprep.subr.mxu0 %v3807_v0 }
 0x7d9   : > { %3284 = vmatpush3.msra.mxu0 %v2992_v2 }
 0x7da   : > { %3285 = vmatprep.subr.mxu0 %v3807_v0 }
 0x7db   : > { %3286 = vmatpush3.msra.mxu0 %v2991_v4 }
 0x7dc   : > { %3287 = vmatprep.subr.mxu0 %v3807_v0 }
 0x7dd   : > { %3288 = vmatpush3.msra.mxu0 %v2990_v6 }
 0x7de   : > { %3292 = vmatprep.subr.mxu0 %v3807_v0 }
 0x896   : > { %v1691_v43 = vpop.f32.mrf.mxu0 }
 0x897   : > { %v1692_v44 = vadd.f32 %v2984_v42, %v1691_v43 }
 0x898   : > { %v3261_v45 = vpop.f32.mrf.mxu0 }
 0x899   : > { %v1695_v46 = vmax.f32 %v1692_v44, 0.0  ;;  %v3007_v45 = vld [vmem:[#allocation7 + $0x1] ss:$0 sm:$0xff] }
 0x89b   : > { %3279 = vmatmul.mubr.msk.f32.vlgmr.msra.gmra.mxu1 %vm1711_vm5, %v1695_v46 }
 0x89c   : > { %3311 = vmatprep.mubr.msk.f32.mxu1 %vm3808_vm0, %v3807_v0  ;;  %3304 = vmatpush3.msra.mxu1 %v3006_v1 }
 0x89d   : > { %3305 = vmatprep.subr.mxu1 %v3807_v0 }
 0x89e   : > { %3306 = vmatpush3.msra.mxu1 %v3005_v3 }
 0x89f   : > { %3307 = vmatprep.subr.mxu1 %v3807_v0 }
 0x8a0   : > { %3308 = vmatpush3.msra.mxu1 %v3004_v5 }
 0x8a1   : > { %3309 = vmatprep.subr.mxu1 %v3807_v0 }
 0x8a2   : > { %3310 = vmatpush3.msra.mxu1 %v3003_v7 }
 0x8a3   : > { %3325 = vmatprep.subr.mxu1 %v3807_v0 }
 0x95b   : > { %v1781_v52 = vpop.f32.mrf.mxu1 }
 0x95c   : > { %v1782_v53 = vadd.f32 %v2986_v47, %v1781_v52 }
 0x95d   : > { %v3280_v54 = vpop.f32.mrf.mxu1 }
 0x95e   : > { %v1785_v55 = vadd.f32 %v1782_v53, %v1610_v38 }
 0x960   : > { %v1788_v57 = vsel %vm934_vm2, %v1785_v55, 0.0 }
 0x961   : > { %1789 = vadd.xlane.f32.xlu1 %v1788_v57 }
 0x9ea   : > { %v1790_v58 = vpop.xlane.xlu1 %1789 }
 0x9eb   : > { %v1791_v59 = vmul.f32 0.03125, %v1790_v58  ;;  %v3018_v58 = vld [vmem:[%s4610_s12 + $0x20] sm:$0xff] }
 0x9ed   : > { %v1792_v60 = vsub.f32 %v1785_v55, %v1791_v59 }
 0x9ef   : > { %v1793_v61 = vmul.f32 %v1792_v60, %v1792_v60 }
 0x9f1   : > { %v1794_v62 = vsel %vm934_vm2, %v1793_v61, 0.0  ;;  %v3022_v61 = vld [vmem:[#allocation8 + $0x1] ss:$0 sm:$0xff] }
 0x9f2   : > { %1795 = vadd.xlane.f32.xlu0 %v1794_v62 }
 0xa7b   : > { %v1796_v8 = vpop.xlane.xlu0 %1795 }
 0xa7c   : > { %v1797_v9 = vmul.f32 0.03125, %v1796_v8 }
 0xa7e   : > { %v1798_v10 = vadd.f32 1e-05, %v1797_v9  ;;  %v3031_v9 = vld [vmem:[%s4614_s16 + $0x38] sm:$0xff] }
 0xa80   : > { %3524 = vrsqrt.f32 %v1798_v10  ;;  %v3030_v10 = vld [vmem:[%s4614_s16 + $0x30] sm:$0xff] }
 0xa8d   : > { %v3525_v11 = vpop.eup %3524 }
 0xa8e   : > { %v1800_v13 = vmul.f32 %v3525_v11, %v1792_v60  ;;  %v3029_v11 = vld [vmem:[%s4614_s16 + $0x28] sm:$0xff] }
 0xa90   : > { %v1807_v16 = vmul.f32 %v2988_v12, %v1800_v13  ;;  %v3028_v12 = vld [vmem:[%s4614_s16 + $0x20] sm:$0xff]  ;;  %v3041_v13 = vld [vmem:[%s4616_s18 + $0x78] sm:$0xff] }
 0xa92   : > { %v4381_v17 = vadd.f32 %v2989_v15, %v1807_v16  ;;  %v3040_v15 = vld [vmem:[%s4616_s18 + $0x70] sm:$0xff]  ;;  %v3039_v16 = vld [vmem:[%s4616_s18 + $0x68] sm:$0xff] }
 0xa94   : > { %3290 = vmatmul.mubr.msk.f32.vlgmr.msra.gmra.mxu0 %vm934_vm2, %v4381_v17  ;;  %3312 = vmatmul.mubr.msk.f32.vlgmr.msra.gmra.mxu1 %vm934_vm2, %v4381_v17 }
 0xa95   : > { %3293 = vmatpush3.msra.mxu0 %v3000_v18  ;;  %3300 = vmatprep.mubr.msk.f32.mxu0 %vm3808_vm0, %v3807_v0  ;;  %v3037_v18 = vld [vmem:[%s4616_s18 + $0x58] sm:$0xff] }
 0xa96   : > { %3294 = vmatprep.subr.mxu0 %v3807_v0  ;;  %3326 = vmatpush3.msra.mxu1 %v4217_v48 }
 0xa97   : > { %3295 = vmatpush3.msra.mxu0 %v2999_v19  ;;  %3327 = vmatprep.subr.mxu1 %v3807_v0 }
 0xa98   : > { %3296 = vmatprep.subr.mxu0 %v3807_v0  ;;  %3328 = vmatpush3.msra.mxu1 %v4222_v49 }
 0xa99   : > { %3297 = vmatpush3.msra.mxu0 %v2998_v14  ;;  %3329 = vmatprep.subr.mxu1 %v3807_v0 }
 0xa9a   : > { %3298 = vmatprep.subr.mxu0 %v3807_v0  ;;  %3330 = vmatpush3.msra.mxu1 %v4229_v50 }
 0xa9b   : > { %3299 = vmatpush3.msra.mxu0 %v2997_v20  ;;  %3331 = vmatprep.subr.mxu1 %v3807_v0 }
 0xa9c   : > { %3301 = vmatmul.mubr.msk.f32.vlgmr.msra.gmra.mxu0 %vm934_vm2, %v4381_v17  ;;  %3314 = vmatprep.subr.mxu0 %v3807_v0 }
 0xa9d   : > { %3322 = vmatprep.mubr.msk.f32.mxu0 %vm3808_vm0, %v3807_v0  ;;  %3332 = vmatpush3.msra.mxu1 %v4236_v51 }
 0xa9e   : > { %3333 = vmatprep.mubr.msk.f32.mxu1 %vm3808_vm0, %v3807_v0  ;;  %3336 = vmatprep.subr.mxu1 %v3807_v0 }
 0xb54   : > { %v1897_v48 = vpop.f32.mrf.mxu0  ;;  %v2063_v49 = vpop.f32.mrf.mxu1 }
 0xb55   : > { %v1898_v33 = vadd.f32 %v2995_v31, %v1897_v48  ;;  %v2064_v46 = vadd.f32 %v3007_v45, %v2063_v49  ;;  %v3026_v49 = vld [vmem:[%s4612_s14 + $0x1] ss:$0 sm:$0xff] }
 0xb56   : > { %v3291_v50 = vpop.f32.mrf.mxu0  ;;  %v3313_v21 = vpop.f32.mrf.mxu1 }
 0xb57   : > { %v2074_v52 = vmul.f32 %v2064_v46, %v4170_v22  ;;  %v2073_v53 = vmul.f32 %v2064_v46, %v4176_v28  ;;  %v2071_v54 = vmul.f32 %v2064_v46, %v4192_v34  ;;  %v3027_v21 = vld [vmem:[%s4613_s15 + $0x1] ss:$0 sm:$0xff] }
 0xb5c   : > { %v1980_v24 = vpop.f32.mrf.mxu0 }
 0xb5d   : > { %v1981_v25 = vadd.f32 %v3001_v23, %v1980_v24 }
 0xb5e   : > { %v3302_v26 = vpop.f32.mrf.mxu0 }
 0xb5f   : > { %v2070_v27 = vmul.f32 %v1981_v25, %v4170_v22  ;;  %v2069_v51 = vmul.f32 %v1981_v25, %v4176_v28  ;;  %v2068_v29 = vmul.f32 %v1981_v25, %v4184_v30  ;;  %v2067_v32 = vmul.f32 %v1981_v25, %v4192_v34  ;;  %v3021_v22 = vld [vmem:[%s4610_s12 + $0x38] sm:$0xff]  ;;  %v3020_v28 = vld [vmem:[%s4610_s12 + $0x30] sm:$0xff]  ;;  %v3035_v26 = vld [vmem:[%s4616_s18 + $0x48] sm:$0xff] }
 0xb60   : > { %v3036_v25 = vld [vmem:[%s4616_s18 + $0x50] sm:$0xff] }
 0xb61   : > { %3315 = vmatpush3.xpose.msk.msra.mxu0 %vm934_vm2, %v2070_v27  ;;  %v3034_v27 = vld [vmem:[%s4616_s18 + $0x40] sm:$0xff] }
 0xb62   : > { %3316 = vmatprep.subr.mxu0 %v3807_v0 }
 0xb65   : > { %3317 = vmatpush3.xpose.msk.msra.mxu0 %vm934_vm2, %v2069_v51  ;;  %v3032_v51 = vld [vmem:[#allocation10 + $0x1] ss:$0 sm:$0xff] }
 0xb66   : > { %3318 = vmatprep.subr.mxu0 %v3807_v0 }
 0xb69   : > { %3319 = vmatpush3.xpose.msk.msra.mxu0 %vm934_vm2, %v2068_v29 }
 0xb6a   : > { %3320 = vmatprep.subr.mxu0 %v3807_v0 }
 0xb6d   : > { %3321 = vmatpush3.xpose.msk.msra.mxu0 %vm934_vm2, %v2067_v32 }
 0xb6e   : > { %3352 = vmatprep.subr.mxu0 %v3807_v0 }
 0xb70   : > { %3323 = vmatmul.mubr.msk.f32.vlgmr.msra.gmra.mxu0 %vm934_vm2, %v1898_v33 }
 0xb71   : > { %3360 = vmatprep.mubr.msk.f32.mxu0 %vm3808_vm0, %v3807_v0  ;;  %3353 = vmatpush3.msra.mxu0 %v3021_v22 }
 0xb72   : > { %3354 = vmatprep.subr.mxu0 %v3807_v0 }
 0xb73   : > { %3355 = vmatpush3.msra.mxu0 %v3020_v28 }
 0xb74   : > { %3356 = vmatprep.subr.mxu0 %v3807_v0 }
 0xc30   : > { %v2156_v35 = vpop.f32.mrf.mxu0 }
 0xc31   : > { %v2160_v36 = vmul.f32 0.35355338, %v2156_v35  ;;  %v3042_v35 = vld [vmem:[#allocation11 + $0x1] ss:$0 sm:$0xff] }
 0xc32   : > { %v3324_v37 = vpop.f32.mrf.mxu0 }
 0xc33   : > { %v2161_v38 = vsel %vm934_vm2, %v2160_v36, -inf }
 0xc34   : > { %2162 = vmax.xlane.f32.xlu1 %v2161_v38 }
 0xcbd   : > { %v2163_v39 = vpop.xlane.xlu1 %2162 }
 0xcbe   : > { %v2164_v40 = vsub.f32 %v2160_v36, %v2163_v39 }
 0xcc0   : > { %v2165_v41 = vmul.f32 1.442695, %v2164_v40 }
 0xcc2   : > { %3526 = vpow2.f32 %v2165_v41 }
 0xccf   : > { %v3527_v42 = vpop.eup %3526 }
 0xcd0   : > { %3334 = vmatmul.mubr.msk.f32.vlgmr.msra.gmra.mxu1 %vm934_vm2, %v3527_v42 }
 0xcd1   : > { %3337 = vmatpush3.msk.msra.mxu1 %vm1348_vm3, %v4248_v56  ;;  %3338 = vmatprep.mubr.msk.f32.mxu1 %vm3808_vm0, %v3807_v0  ;;  %v2072_v56 = vmul.f32 %v2064_v46, %v4184_v30  ;;  %v3019_v30 = vld [vmem:[%s4610_s12 + $0x28] sm:$0xff]  ;;  %v2718_v46 = vld [vmem:[%s4620_s22 + $0x18] sm:$0xff] }
 0xcd2   : > { %3341 = vmatprep.subr.mxu1 %v3807_v0  ;;  %3357 = vmatpush3.msra.mxu0 %v3019_v30  ;;  %v3046_v30 = vld [vmem:[%s4618_s20 + $0x1] ss:$0 sm:$0xff] }
 0xcd3   : > { %3358 = vmatprep.subr.mxu0 %v3807_v0 }
 0xcd4   : > { %3359 = vmatpush3.msra.mxu0 %v3018_v58 }
 0xcd5   : > { %3374 = vmatprep.subr.mxu0 %v3807_v0 }
 0xd90   : > { %v2236_v43 = vpop.f32.mrf.mxu1 }
 0xd91   : > { %3528 = vrcp.f32 %v2236_v43 }
 0xd92   : > { %v3335_v44 = vpop.f32.mrf.mxu1 }
 0xd9e   : > { %v3529_v47 = vpop.eup %3528 }
 0xd9f   : > { %3339 = vmatmul.mubr.msk.f32.vlgmr.msra.gmra.mxu1 %vm1344_vm4, %v3529_v47  ;;  %v2717_v47 = vld [vmem:[%s4620_s22 + $0x10] sm:$0xff] }
 0xda0   : > { %3342 = vmatpush3.msra.mxu1 %v2074_v52  ;;  %3349 = vmatprep.mubr.msk.f32.mxu1 %vm3808_vm0, %v3807_v0  ;;  %v2716_v52 = vld [vmem:[%s4620_s22 + $0x8] sm:$0xff] }
 0xda1   : > { %3343 = vmatprep.subr.mxu1 %v3807_v0 }
 0xda2   : > { %3344 = vmatpush3.msra.mxu1 %v2073_v53  ;;  %v2715_v53 = vld [vmem:[%s4620_s22] sm:$0xff] }
 0xda3   : > { %3345 = vmatprep.subr.mxu1 %v3807_v0 }
 0xda4   : > { %3346 = vmatpush3.msra.mxu1 %v2072_v56 }
 0xda5   : > { %3347 = vmatprep.subr.mxu1 %v3807_v0 }
 0xda6   : > { %3348 = vmatpush3.msra.mxu1 %v2071_v54 }
 0xda7   : > { %3363 = vmatprep.subr.mxu1 %v3807_v0 }
 0xe5f   : > { %v2310_v34 = vpop.f32.mrf.mxu1 }
 0xe60   : > { %v2314_v55 = vmul.f32 %v3527_v42, %v2310_v34 }
 0xe61   : > { %v3340_v57 = vpop.f32.mrf.mxu1 }
 0xe62   : > { %3350 = vmatmul.mubr.msk.f32.vlgmr.msra.gmra.mxu1 %vm934_vm2, %v2314_v55  ;;  %v3047_v55 = vld [vmem:[%s4619_s21 + $0x1] ss:$0 sm:$0xff] }
 0xe63   : > { %3371 = vmatprep.mubr.msk.f32.mxu1 %vm3808_vm0, %v3807_v0  ;;  %3364 = vmatpush3.msra.mxu1 %v3031_v9 }
 0xe64   : > { %3365 = vmatprep.subr.mxu1 %v3807_v0 }
 0xe65   : > { %3366 = vmatpush3.msra.mxu1 %v3030_v10 }
 0xe66   : > { %3367 = vmatprep.subr.mxu1 %v3807_v0 }
 0xe67   : > { %3368 = vmatpush3.msra.mxu1 %v3029_v11 }
 0xe68   : > { %3369 = vmatprep.subr.mxu1 %v3807_v0 }
 0xe69   : > { %3370 = vmatpush3.msra.mxu1 %v3028_v12 }
 0xe6a   : > { %3393 = vmatprep.subr.mxu1 %v3807_v0 }
 0xf22   : > { %v2384_v59 = vpop.f32.mrf.mxu1 }
 0xf23   : > { %3361 = vmatmul.mubr.msk.f32.vlgmr.msra.gmra.mxu0 %vm934_vm2, %v2384_v59 }
 0xf24   : > { %v3351_v60 = vpop.f32.mrf.mxu1  ;;  %3390 = vmatprep.mubr.msk.f32.mxu0 %vm3808_vm0, %v3807_v0  ;;  %3375 = vmatpush3.msra.mxu0 %v3041_v13 }
 0xf25   : > { %3376 = vmatprep.subr.mxu0 %v3807_v0 }
 0xf26   : > { %3377 = vmatpush3.msra.mxu0 %v3040_v15 }
 0xf27   : > { %3378 = vmatprep.subr.mxu0 %v3807_v0 }
 0xf28   : > { %3379 = vmatpush3.msra.mxu0 %v3039_v16 }
 0xf29   : > { %3380 = vmatprep.subr.mxu0 %v3807_v0 }
 0xfe3   : > { %v2470_v62 = vpop.f32.mrf.mxu0 }
 0xfe4   : > { %v2471_v63 = vadd.f32 %v3022_v61, %v2470_v62 }
 0xfe5   : > { %v3362_v1 = vpop.f32.mrf.mxu0 }
 0xfe6   : > { %v2474_v2 = vadd.f32 %v2471_v63, %v4381_v17  ;;  %v3038_v17 = vld [vmem:[%s4616_s18 + $0x60] sm:$0xff] }
 0xfe7   : > { %3381 = vmatpush3.msra.mxu0 %v3038_v17 }
 0xfe8   : > { %v2479_v3 = vsel %vm934_vm2, %v2474_v2, 0.0  ;;  %3382 = vmatprep.subr.mxu0 %v3807_v0 }
 0xfe9   : > { %2480 = vadd.xlane.f32.xlu0 %v2479_v3  ;;  %3383 = vmatpush3.msra.mxu0 %v3037_v18 }
 0xfea   : > { %3384 = vmatprep.subr.mxu0 %v3807_v0 }
 0xfeb   : > { %3385 = vmatpush3.msra.mxu0 %v3036_v25 }
 0xfec   : > { %3386 = vmatprep.subr.mxu0 %v3807_v0 }
 0xfed   : > { %3387 = vmatpush3.msra.mxu0 %v3035_v26 }
 0xfee   : > { %3388 = vmatprep.subr.mxu0 %v3807_v0 }
 0xfef   : > { %3389 = vmatpush3.msra.mxu0 %v3034_v27 }
0x1072   : > { %v2481_v4 = vpop.xlane.xlu0 %2480 }
0x1073   : > { %v2482_v5 = vmul.f32 0.03125, %v2481_v4 }
0x1075   : > { %v2483_v6 = vsub.f32 %v2474_v2, %v2482_v5 }
0x1077   : > { %v2484_v7 = vmul.f32 %v2483_v6, %v2483_v6 }
0x1079   : > { %v2485_v8 = vsel %vm934_vm2, %v2484_v7, 0.0 }
0x107a   : > { %2486 = vadd.xlane.f32.xlu1 %v2485_v8 }
0x1103   : > { %v2487_v19 = vpop.xlane.xlu1 %2486 }
0x1104   : > { %v2488_v14 = vmul.f32 0.03125, %v2487_v19 }
0x1106   : > { %v2489_v20 = vadd.f32 1e-05, %v2488_v14 }
0x1108   : > { %3530 = vrsqrt.f32 %v2489_v20 }
0x1115   : > { %v3531_v48 = vpop.eup %3530 }
0x1116   : > { %v2491_v50 = vmul.f32 %v3531_v48, %v2483_v6 }
0x1118   : > { %v2498_v23 = vmul.f32 %v3026_v49, %v2491_v50 }
0x111a   : > { %v2505_v24 = vadd.f32 %v3027_v21, %v2498_v23 }
0x111c   : > { %3372 = vmatmul.mubr.msk.f32.vlgmr.msra.gmra.mxu1 %vm934_vm2, %v2505_v24 }
0x111d   : > { %3401 = vmatprep.mubr.msk.f32.mxu1 %vm3808_vm0, %v3807_v0  ;;  %3394 = vmatpush3.msra.mxu1 %v2718_v46 }
0x111e   : > { %3395 = vmatprep.subr.mxu1 %v3807_v0 }
0x111f   : > { %3396 = vmatpush3.msra.mxu1 %v2717_v47 }
0x1120   : > { %3397 = vmatprep.subr.mxu1 %v3807_v0 }
0x1121   : > { %3398 = vmatpush3.msra.mxu1 %v2716_v52 }
0x1122   : > { %3399 = vmatprep.subr.mxu1 %v3807_v0  ;;  %v2719_v0 = vld [vmem:[#allocation13] sm:$0x1] }
0x1123   : > { %3400 = vmatpush3.msra.mxu1 %v2715_v53 }
0x11dc   : > { %v2588_v29 = vpop.f32.mrf.mxu1 }
0x11dd   : > { %v2589_v31 = vadd.f32 %v3032_v51, %v2588_v29 }
0x11de   : > { %v3373_v32 = vpop.f32.mrf.mxu1 }
0x11df   : > { %v2592_v33 = vmax.f32 %v2589_v31, 0.0 }
0x11e1   : > { %3391 = vmatmul.mubr.msk.f32.vlgmr.msra.gmra.mxu0 %vm1711_vm5, %v2592_v33 }
0x12a1   : > { %v2679_v36 = vpop.f32.mrf.mxu0 }
0x12a2   : > { %v2680_v37 = vadd.f32 %v3042_v35, %v2679_v36 }
0x12a3   : > { %v3392_v38 = vpop.f32.mrf.mxu0 }
0x12a4   : > { %v2683_v39 = vadd.f32 %v2680_v37, %v2505_v24 }
0x12a6   : > { %v2688_v40 = vsel %vm934_vm2, %v2683_v39, 0.0 }
0x12a7   : > { %2689 = vadd.xlane.f32.xlu0 %v2688_v40 }
0x1330   : > { %v2690_v41 = vpop.xlane.xlu0 %2689 }
0x1331   : > { %v2691_v42 = vmul.f32 0.03125, %v2690_v41 }
0x1333   : > { %v2692_v43 = vsub.f32 %v2683_v39, %v2691_v42 }
0x1335   : > { %v2693_v44 = vmul.f32 %v2692_v43, %v2692_v43 }
0x1337   : > { %v2694_v45 = vsel %vm934_vm2, %v2693_v44, 0.0 }
0x1338   : > { %2695 = vadd.xlane.f32.xlu1 %v2694_v45 }
0x13c1   : > { %v2696_v56 = vpop.xlane.xlu1 %2695 }
0x13c2   : > { %v2697_v54 = vmul.f32 0.03125, %v2696_v56 }
0x13c4   : > { %v2698_v22 = vadd.f32 1e-05, %v2697_v54 }
0x13c6   : > { %3532 = vrsqrt.f32 %v2698_v22 }
0x13d3   : > { %v3533_v28 = vpop.eup %3532 }
0x13d4   : > { %v2700_v34 = vmul.f32 %v3533_v28, %v2692_v43 }
0x13d6   : > { %v2707_v57 = vmul.f32 %v3046_v30, %v2700_v34 }
0x13d8   : > { %v2714_v58 = vadd.f32 %v3047_v55, %v2707_v57 }
0x13da   : > { %v2721_v59 = vrot.slane %v2714_v58, 7 }
0x13dc   : > { %3402 = vmatmul.mubr.msk.f32.vlgmr.msra.gmra.mxu1 %vm934_vm2, %v2721_v59 }
0x149c   : > { %v2790_v60 = vpop.f32.mrf.mxu1 }
0x149d   : > { %v2791_v61 = vadd.f32 %v2790_v60, %v2719_v0 }
0x149e   : > { %v3403_v62 = vpop.f32.mrf.mxu1 }
0x149f   : > { %v2795_v63 = vsel %vm2794_vm6, %v2791_v61, -inf }
0x14a0   : > { %2796 = vmax.xlane.f32.xlu0 %v2795_v63 }
0x1529   : > { %v2797_v1 = vpop.xlane.xlu0 %2796 }
0x152a   : > { %v2798_v2 = vsub.f32 %v2791_v61, %v2797_v1 }
0x152c   : > { %v2799_v3 = vmul.f32 1.442695, %v2798_v2 }
0x152e   : > { %3534 = vpow2.f32 %v2799_v3 }
0x153b   : > { %v3535_v4 = vpop.eup %3534 }
0x153c   : > { %v2801_v5 = vsel %vm2794_vm6, %v3535_v4, 0.0 }
0x153d   : > { %2802 = vadd.xlane.f32.xlu1 %v2801_v5 }
0x15c6   : > { %v2803_v6 = vpop.xlane.xlu1 %2802 }
0x15c7   : > { %3536 = vrcp.f32 %v2803_v6 }
0x15d4   : > { %v3537_v7 = vpop.eup %3536 }
0x15d5   : > { %v2805_v8 = vmul.f32 %v3537_v7, %v3535_v4 }
0x15d7   : > { %2806 = vst.msk [vmem:[%s825_s0] sm:$0x1] %vm2794_vm6, %v2805_v8 }
0x15d8   : > { %3733 = shalt.err (!%p3730_p8)
}
0x15d9   : > { %s3734_s5 = scalar_lea.hbm %s2818_s4, 16  ;;  %s3738_s0 = scalar_lea.hbm %s4687_s24, 32 }
0x15da   : > { %p3735_p11 = scmp.ne.s32.totalorder %s2818_s4, %s3734_s5  ;;  %p3739_p3 = scmp.lt.s32.totalorder %s2818_s4, %s4687_s24 }
0x15db   : > { %p3740_p1 = scmp.lt.s32.totalorder %s3738_s0, %s3734_s5 }
0x15dc   : > { %p3736_p0 = pnand %p3735_p11, %p4688_p9 }
0x15dd   : > { %p3741_p2 = por %p3740_p1, %p3739_p3 }
0x15de   : > { %p3737_p12 = pneg %p3736_p0 }
0x15e0   : > { %p3742_p4 = pnand %p3741_p2, %p3737_p12 }
0x15e2   : > { %3745 = shalt.err (!%p3742_p4)
}
0x15e3   : > { %3432 = dma.vmem_to_hbm [thread:$0]  (%p4688_p9), %s2821_s30, 16, %s2818_s4, %s2808_s25  }
0x15e4 PF: > { %s4689_s2 = sld [smem:[#allocation22_spill]] }
0x15e5   : > { %s4690_s7 = sld [smem:[#allocation20_spill]] }
0x15e6   : > { %s4691_s9 = sld [smem:[#allocation25_spill]] }
0x15ea   : > { %p3474_p7 = scmp.ge.s32.totalorder %s4689_s2, 2 }
0x15eb   : > { %s2832_s6 = sand.u32 1, %s4690_s7  }
0x15ec   : > { %p4692_p5 = scmp.ne.s32.totalorder %s4691_s9, 0  ;;  %s2833_s1 = scalar_lea.sflag [#allocation4], %s2832_s6 }
0x15ee   : > { %p3457_p6 = pnand %p3474_p7, %p4692_p5 }
0x15f0   : > { %p3458_p10 = pneg %p3457_p6 }
0x15f2   : > { %3779 = dma.done.wait (%p3458_p10), %s2833_s1, 16  }
0x15f3   : > { %3781 = vsyncadd (%p3458_p10), %s2833_s1, 4294967280  ;;  %s4693_s28 = sld [smem:[#allocation23_spill]]  ;;  %s4696_s5 = smov %s3788_s26 }
0x15f4   : > { %s4694_s8 = sld [smem:[#allocation21_spill]] }
0x15f5   : > { %s4695_s27 = sld [smem:[#allocation24_spill]] }
0x15f9   : > { %p38_p13 = scmp.ge.s32.totalorder %s4693_s28, 4  }
0x15fa   : > { %s4697_s26 = smov %s4694_s8 }
0x15fb   :  { %40 = sbr.rel (!%p38_p13) target bundleno = 20 (0x14), region = 196 }
0x1600   :  { %2837 = vsyncpa [#allocation3], 1 }
0x1601   :  { %2839 = vsyncpa [#allocation3 + $0x1], 1 }
0x1602   :  { %2840 = vsyncpa [#allocation6], 1 }
0x1603   :  { %2841 = vsyncpa [#allocation9], 1 }
0x1604   :  { %2842 = vsyncpa [#allocation12], 1 }
0x1605   :  { %2843 = vsyncpa [#allocation4], 1 }
0x1606   :  { %2845 = vsyncpa [#allocation4 + $0x1], 1 }

</bundles_post_ra>
